<compile_context>
chip_gen: v7x
topology: tpu7x:2x2x1
jax: 0.10.0
libtpu: 0.0.40
codegen_flags: <defaults>
</compile_context>

<pallas_src>
import functools

import jax
import jax.numpy as jnp
from jax.experimental import pallas as pl
from jax.experimental.pallas import tpu as pltpu


# ----------------------------------------------------------------------------
# Fused EncoderOld kernel
# ----------------------------------------------------------------------------
def encoder_old_kernel(x_ref, ahat_ref, wcat1_ref, w2_ref, vec_ref,
                       x1_ref, x2_ref, *, hidden, res1_linear):
    x = x_ref[...]                                   # (N, Cin) f32
    xb = x.astype(jnp.bfloat16)
    ahat = ahat_ref[...]                             # (N, N)  bf16 (GCN-normalized)
    n = x.shape[0]
    inv_n = 1.0 / n                                  # static

    # packed per-channel vectors, one (8, H) buffer:
    #   0: gcn1 bias   1: bn1 gamma   2: bn1 beta   3: res1 bias
    #   4: gcn2 bias   5: bn2 gamma   6: bn2 beta   7: zeros (pad)
    bg1 = vec_ref[0:1, :]
    g1 = vec_ref[1:2, :]
    be1 = vec_ref[2:3, :]
    br1 = vec_ref[3:4, :]
    bg2 = vec_ref[4:5, :]
    g2 = vec_ref[5:6, :]
    be2 = vec_ref[6:7, :]

    # ---------------- layer 1 ----------------
    # One matmul computes both X W_gcn1^T and X W_res1^T (concatenated weights).
    hw = jnp.dot(xb, wcat1_ref[...], preferred_element_type=jnp.float32)
    if res1_linear:
        xw1 = hw[:, :hidden]                         # (N, H)
        ident1 = hw[:, hidden:] + br1                # residual Linear(x)
    else:
        xw1 = hw
        ident1 = x                                   # residual = Identity

    z1 = jnp.dot(ahat, xw1.astype(jnp.bfloat16),
                 preferred_element_type=jnp.float32) + bg1      # GCNConv
    mean1 = jnp.sum(z1, axis=0, keepdims=True) * inv_n          # BN (train stats)
    d1 = z1 - mean1
    var1 = jnp.sum(d1 * d1, axis=0, keepdims=True) * inv_n
    y1 = d1 * jax.lax.rsqrt(var1 + 1e-5) * g1 + be1
    x1 = jnp.maximum(y1, 0.0) + ident1                          # ReLU + residual
    x1_ref[...] = x1

    # ---------------- layer 2 (residual = Identity, skip eye matmul) ----------------
    xw2 = jnp.dot(x1.astype(jnp.bfloat16), w2_ref[...],
                  preferred_element_type=jnp.float32)
    z2 = jnp.dot(ahat, xw2.astype(jnp.bfloat16),
                 preferred_element_type=jnp.float32) + bg2
    mean2 = jnp.sum(z2, axis=0, keepdims=True) * inv_n
    d2 = z2 - mean2
    var2 = jnp.sum(d2 * d2, axis=0, keepdims=True) * inv_n
    y2 = d2 * jax.lax.rsqrt(var2 + 1e-5) * g2 + be2
    x2_ref[...] = jnp.maximum(y2, 0.0) + x1


# ----------------------------------------------------------------------------
# Wrapper: dense GCN normalization + single pallas_call dispatch
# ----------------------------------------------------------------------------
def _full_spec(shape):
    nd = len(shape)
    return pl.BlockSpec(shape, lambda i, _nd=nd: (0,) * _nd)


def gcn_norm_adj(edge_index, n):
    src, dst = edge_index[0], edge_index[1]
    a = jnp.zeros((n, n), jnp.float32).at[dst, src].set(1.0)
    a = a + jnp.eye(n, dtype=jnp.float32)            # add self loops
    deg = jnp.sum(a, axis=1)
    dinv = 1.0 / jnp.sqrt(deg)
    return a * dinv[:, None] * dinv[None, :]


def encoder_old_forward(x, edge_index, params, hidden):
    n, cin = x.shape
    ahat = gcn_norm_adj(edge_index, n).astype(jnp.bfloat16)

    p1, p2 = params["layer1"], params["layer2"]
    res1_linear = cin != hidden
    if res1_linear:
        wcat1 = jnp.concatenate([p1["wg"].T, p1["wr"].T], axis=1)  # (Cin, 2H)
        br1 = p1["br"]
    else:
        wcat1 = p1["wg"].T                                         # (Cin, H)
        br1 = jnp.zeros((hidden,), jnp.float32)
    w2 = p2["wg"].T                                                # (H, H)

    zeros = jnp.zeros((hidden,), jnp.float32)
    vecs = jnp.stack([p1["bg"], p1["gamma"], p1["beta"], br1,
                      p2["bg"], p2["gamma"], p2["beta"], zeros], axis=0)  # (8, H)

    args = (x.astype(jnp.float32),
            ahat,
            wcat1.astype(jnp.bfloat16),
            w2.astype(jnp.bfloat16),
            vecs)

    kernel = functools.partial(encoder_old_kernel, hidden=hidden,
                               res1_linear=res1_linear)
    out_shape = (jax.ShapeDtypeStruct((n, hidden), jnp.float32),
                 jax.ShapeDtypeStruct((n, hidden), jnp.float32))

    x1, x2 = pl.pallas_call(
        kernel,
        out_shape=out_shape,
        grid=(1,),
        in_specs=[_full_spec(a.shape) for a in args],
        out_specs=(_full_spec((n, hidden)), _full_spec((n, hidden))),
        compiler_params=pltpu.CompilerParams(dimension_semantics=("arbitrary",)),
    )(*args)
    return x1, x2


# ----------------------------------------------------------------------------
# Deterministic parameter init (PyTorch-style uniform fan-in bounds)
# ----------------------------------------------------------------------------
def _init_linear(key, out_c, in_c):
    k1, k2 = jax.random.split(key)
    bound = 1.0 / (in_c ** 0.5)
    w = jax.random.uniform(k1, (out_c, in_c), jnp.float32, -bound, bound)
    b = jax.random.uniform(k2, (out_c,), jnp.float32, -bound, bound)
    return w, b


def init_crb(key, in_c, out_c):
    k1, k2 = jax.random.split(key)
    wg, bg = _init_linear(k1, out_c, in_c)           # GCNConv weight / bias
    gamma = jnp.ones((out_c,), jnp.float32)          # BatchNorm1d affine
    beta = jnp.zeros((out_c,), jnp.float32)
    p = dict(wg=wg, bg=bg, gamma=gamma, beta=beta)
    if in_c != out_c:                                # residual nn.Linear
        wr, br = _init_linear(k2, out_c, in_c)
        p.update(wr=wr, br=br)
    return p


def init_params(key, in_c, hidden):
    k1, k2 = jax.random.split(key)
    return dict(layer1=init_crb(k1, in_c, hidden),
                layer2=init_crb(k2, hidden, hidden))


def ring_edges(n):
    src = jnp.arange(n, dtype=jnp.int32)
    dst = (src + 1) % n
    return jnp.stack([jnp.concatenate([src, dst]), jnp.concatenate([dst, src])])


# ----------------------------------------------------------------------------
if __name__ == "__main__":
    key = jax.random.PRNGKey(0)
    kx, kp = jax.random.split(key)

    n_nodes, in_channels, hidden_channels = 256, 16, 128
    x = jax.random.normal(kx, (n_nodes, in_channels), jnp.float32)
    edge_index = ring_edges(n_nodes)                 # (2, 2*N) undirected ring
    params = init_params(kp, in_channels, hidden_channels)

    fwd = jax.jit(functools.partial(encoder_old_forward, hidden=hidden_channels))
    x1, x2 = fwd(x, edge_index, params)
    x1, x2 = jax.block_until_ready((x1, x2))

    assert x1.shape == (n_nodes, hidden_channels) and x1.dtype == jnp.float32
    assert x2.shape == (n_nodes, hidden_channels) and x2.dtype == jnp.float32
    assert bool(jnp.all(jnp.isfinite(x1))) and bool(jnp.all(jnp.isfinite(x2)))
    print("KERNEL_OK")
</pallas_src>

<mosaic_0001>
module attributes {stable_mosaic.version = 11 : i64} {
  func.func @encoder_old_kernel(%arg0: i32, %arg1: memref<256x16xf32, #tpu.memory_space<vmem>>, %arg2: memref<256x256xbf16, #tpu.memory_space<vmem>>, %arg3: memref<16x256xbf16, #tpu.memory_space<vmem>>, %arg4: memref<128x128xbf16, #tpu.memory_space<vmem>>, %arg5: memref<8x128xf32, #tpu.memory_space<vmem>>, %arg6: memref<256x128xf32, #tpu.memory_space<vmem>>, %arg7: memref<256x128xf32, #tpu.memory_space<vmem>>) attributes {dimension_semantics = [#tpu.dimension_semantics<arbitrary>], iteration_bounds = array<i64: 1>, scalar_prefetch = 0 : i64, scratch_operands = 0 : i64, tpu.core_type = #tpu.core_type<tc>, window_params = [{pipeline_mode = #tpu.pipeline_mode<synchronous>, transform_indices = @transform_0, window_bounds = array<i64: 256, 16>}, {pipeline_mode = #tpu.pipeline_mode<synchronous>, transform_indices = @transform_1, window_bounds = array<i64: 256, 256>}, {pipeline_mode = #tpu.pipeline_mode<synchronous>, transform_indices = @transform_2, window_bounds = array<i64: 16, 256>}, {pipeline_mode = #tpu.pipeline_mode<synchronous>, transform_indices = @transform_3, window_bounds = array<i64: 128, 128>}, {pipeline_mode = #tpu.pipeline_mode<synchronous>, transform_indices = @transform_4, window_bounds = array<i64: 8, 128>}, {pipeline_mode = #tpu.pipeline_mode<synchronous>, transform_indices = @transform_5, window_bounds = array<i64: 256, 128>}, {pipeline_mode = #tpu.pipeline_mode<synchronous>, transform_indices = @transform_6, window_bounds = array<i64: 256, 128>}]} {
    %c0 = arith.constant 0 : index
    %c0_0 = arith.constant 0 : index
    %0 = vector.load %arg1[%c0, %c0_0] : memref<256x16xf32, #tpu.memory_space<vmem>>, vector<256x16xf32>
    %1 = arith.truncf %0 : vector<256x16xf32> to vector<256x16xbf16>
    %c0_1 = arith.constant 0 : index
    %c0_2 = arith.constant 0 : index
    %2 = vector.load %arg2[%c0_1, %c0_2] : memref<256x256xbf16, #tpu.memory_space<vmem>>, vector<256x256xbf16>
    %c0_3 = arith.constant 0 : index
    %c0_4 = arith.constant 0 : index
    %3 = vector.load %arg5[%c0_3, %c0_4] : memref<8x128xf32, #tpu.memory_space<vmem>>, vector<1x128xf32>
    %c1 = arith.constant 1 : index
    %c0_5 = arith.constant 0 : index
    %4 = vector.load %arg5[%c1, %c0_5] : memref<8x128xf32, #tpu.memory_space<vmem>>, vector<1x128xf32>
    %c2 = arith.constant 2 : index
    %c0_6 = arith.constant 0 : index
    %5 = vector.load %arg5[%c2, %c0_6] : memref<8x128xf32, #tpu.memory_space<vmem>>, vector<1x128xf32>
    %c3 = arith.constant 3 : index
    %c0_7 = arith.constant 0 : index
    %6 = vector.load %arg5[%c3, %c0_7] : memref<8x128xf32, #tpu.memory_space<vmem>>, vector<1x128xf32>
    %c4 = arith.constant 4 : index
    %c0_8 = arith.constant 0 : index
    %7 = vector.load %arg5[%c4, %c0_8] : memref<8x128xf32, #tpu.memory_space<vmem>>, vector<1x128xf32>
    %c5 = arith.constant 5 : index
    %c0_9 = arith.constant 0 : index
    %8 = vector.load %arg5[%c5, %c0_9] : memref<8x128xf32, #tpu.memory_space<vmem>>, vector<1x128xf32>
    %c6 = arith.constant 6 : index
    %c0_10 = arith.constant 0 : index
    %9 = vector.load %arg5[%c6, %c0_10] : memref<8x128xf32, #tpu.memory_space<vmem>>, vector<1x128xf32>
    %c0_11 = arith.constant 0 : index
    %c0_12 = arith.constant 0 : index
    %10 = vector.load %arg3[%c0_11, %c0_12] : memref<16x256xbf16, #tpu.memory_space<vmem>>, vector<16x256xbf16>
    %cst = arith.constant dense<0.000000e+00> : vector<256x256xf32>
    %11 = tpu.matmul %1, %10, %cst {dimension_numbers = #tpu.dot_dimension_numbers<[1], [0], [0], [1], [0, 0, 1, 1], [], []>} : vector<256x16xbf16>, vector<16x256xbf16>, vector<256x256xf32> -> vector<256x256xf32>
    %12 = vector.extract_strided_slice %11 {offsets = [0, 0], sizes = [256, 128], strides = [1, 1]} : vector<256x256xf32> to vector<256x128xf32>
    %13 = vector.extract_strided_slice %11 {offsets = [0, 128], sizes = [256, 128], strides = [1, 1]} : vector<256x256xf32> to vector<256x128xf32>
    %14 = vector.broadcast %6 : vector<1x128xf32> to vector<256x128xf32>
    %15 = arith.addf %13, %14 : vector<256x128xf32>
    %16 = arith.truncf %12 : vector<256x128xf32> to vector<256x128xbf16>
    %cst_13 = arith.constant dense<0.000000e+00> : vector<256x128xf32>
    %17 = tpu.matmul %2, %16, %cst_13 {dimension_numbers = #tpu.dot_dimension_numbers<[1], [0], [0], [1], [0, 0, 1, 1], [], []>} : vector<256x256xbf16>, vector<256x128xbf16>, vector<256x128xf32> -> vector<256x128xf32>
    %18 = vector.broadcast %3 : vector<1x128xf32> to vector<256x128xf32>
    %19 = arith.addf %17, %18 : vector<256x128xf32>
    %cst_14 = arith.constant dense<0.000000e+00> : vector<128xf32>
    %20 = vector.multi_reduction <add>, %19, %cst_14 [0] : vector<256x128xf32> to vector<128xf32>
    %21 = vector.shape_cast %20 : vector<128xf32> to vector<1x128xf32>
    %cst_15 = arith.constant 3.906250e-03 : f32
    %22 = vector.broadcast %cst_15 : f32 to vector<1x128xf32>
    %23 = arith.mulf %21, %22 : vector<1x128xf32>
    %24 = vector.broadcast %23 : vector<1x128xf32> to vector<256x128xf32>
    %25 = arith.subf %19, %24 : vector<256x128xf32>
    %26 = arith.mulf %25, %25 : vector<256x128xf32>
    %cst_16 = arith.constant dense<0.000000e+00> : vector<128xf32>
    %27 = vector.multi_reduction <add>, %26, %cst_16 [0] : vector<256x128xf32> to vector<128xf32>
    %28 = vector.shape_cast %27 : vector<128xf32> to vector<1x128xf32>
    %cst_17 = arith.constant 3.906250e-03 : f32
    %29 = vector.broadcast %cst_17 : f32 to vector<1x128xf32>
    %30 = arith.mulf %28, %29 : vector<1x128xf32>
    %cst_18 = arith.constant 9.99999974E-6 : f32
    %31 = vector.broadcast %cst_18 : f32 to vector<1x128xf32>
    %32 = arith.addf %30, %31 : vector<1x128xf32>
    %33 = math.rsqrt %32 : vector<1x128xf32>
    %34 = vector.broadcast %33 : vector<1x128xf32> to vector<256x128xf32>
    %35 = arith.mulf %25, %34 : vector<256x128xf32>
    %36 = vector.broadcast %4 : vector<1x128xf32> to vector<256x128xf32>
    %37 = arith.mulf %35, %36 : vector<256x128xf32>
    %38 = vector.broadcast %5 : vector<1x128xf32> to vector<256x128xf32>
    %39 = arith.addf %37, %38 : vector<256x128xf32>
    %cst_19 = arith.constant 0.000000e+00 : f32
    %40 = vector.broadcast %cst_19 : f32 to vector<256x128xf32>
    %41 = arith.maximumf %39, %40 : vector<256x128xf32>
    %42 = arith.addf %41, %15 : vector<256x128xf32>
    %c0_20 = arith.constant 0 : index
    %c0_21 = arith.constant 0 : index
    %43 = vector.load %arg6[%c0_20, %c0_21] : memref<256x128xf32, #tpu.memory_space<vmem>>, vector<256x128xf32>
    tpu.vector_store %arg6[%c0_20, %c0_21], %42 {strides = array<i32>} : memref<256x128xf32, #tpu.memory_space<vmem>>, vector<256x128xf32>,
    %44 = arith.truncf %42 : vector<256x128xf32> to vector<256x128xbf16>
    %c0_22 = arith.constant 0 : index
    %c0_23 = arith.constant 0 : index
    %45 = vector.load %arg4[%c0_22, %c0_23] : memref<128x128xbf16, #tpu.memory_space<vmem>>, vector<128x128xbf16>
    %cst_24 = arith.constant dense<0.000000e+00> : vector<256x128xf32>
    %46 = tpu.matmul %44, %45, %cst_24 {dimension_numbers = #tpu.dot_dimension_numbers<[1], [0], [0], [1], [0, 0, 1, 1], [], []>} : vector<256x128xbf16>, vector<128x128xbf16>, vector<256x128xf32> -> vector<256x128xf32>
    %47 = arith.truncf %46 : vector<256x128xf32> to vector<256x128xbf16>
    %cst_25 = arith.constant dense<0.000000e+00> : vector<256x128xf32>
    %48 = tpu.matmul %2, %47, %cst_25 {dimension_numbers = #tpu.dot_dimension_numbers<[1], [0], [0], [1], [0, 0, 1, 1], [], []>} : vector<256x256xbf16>, vector<256x128xbf16>, vector<256x128xf32> -> vector<256x128xf32>
    %49 = vector.broadcast %7 : vector<1x128xf32> to vector<256x128xf32>
    %50 = arith.addf %48, %49 : vector<256x128xf32>
    %cst_26 = arith.constant dense<0.000000e+00> : vector<128xf32>
    %51 = vector.multi_reduction <add>, %50, %cst_26 [0] : vector<256x128xf32> to vector<128xf32>
    %52 = vector.shape_cast %51 : vector<128xf32> to vector<1x128xf32>
    %cst_27 = arith.constant 3.906250e-03 : f32
    %53 = vector.broadcast %cst_27 : f32 to vector<1x128xf32>
    %54 = arith.mulf %52, %53 : vector<1x128xf32>
    %55 = vector.broadcast %54 : vector<1x128xf32> to vector<256x128xf32>
    %56 = arith.subf %50, %55 : vector<256x128xf32>
    %57 = arith.mulf %56, %56 : vector<256x128xf32>
    %cst_28 = arith.constant dense<0.000000e+00> : vector<128xf32>
    %58 = vector.multi_reduction <add>, %57, %cst_28 [0] : vector<256x128xf32> to vector<128xf32>
    %59 = vector.shape_cast %58 : vector<128xf32> to vector<1x128xf32>
    %cst_29 = arith.constant 3.906250e-03 : f32
    %60 = vector.broadcast %cst_29 : f32 to vector<1x128xf32>
    %61 = arith.mulf %59, %60 : vector<1x128xf32>
    %cst_30 = arith.constant 9.99999974E-6 : f32
    %62 = vector.broadcast %cst_30 : f32 to vector<1x128xf32>
    %63 = arith.addf %61, %62 : vector<1x128xf32>
    %64 = math.rsqrt %63 : vector<1x128xf32>
    %65 = vector.broadcast %64 : vector<1x128xf32> to vector<256x128xf32>
    %66 = arith.mulf %56, %65 : vector<256x128xf32>
    %67 = vector.broadcast %8 : vector<1x128xf32> to vector<256x128xf32>
    %68 = arith.mulf %66, %67 : vector<256x128xf32>
    %69 = vector.broadcast %9 : vector<1x128xf32> to vector<256x128xf32>
    %70 = arith.addf %68, %69 : vector<256x128xf32>
    %cst_31 = arith.constant 0.000000e+00 : f32
    %71 = vector.broadcast %cst_31 : f32 to vector<256x128xf32>
    %72 = arith.maximumf %70, %71 : vector<256x128xf32>
    %73 = arith.addf %72, %42 : vector<256x128xf32>
    %c0_32 = arith.constant 0 : index
    %c0_33 = arith.constant 0 : index
    %74 = vector.load %arg7[%c0_32, %c0_33] : memref<256x128xf32, #tpu.memory_space<vmem>>, vector<256x128xf32>
    tpu.vector_store %arg7[%c0_32, %c0_33], %73 {strides = array<i32>} : memref<256x128xf32, #tpu.memory_space<vmem>>, vector<256x128xf32>,
    return
  }
  func.func @transform_0(%arg0: i32) -> (i32, i32) {
    %c0_i32 = arith.constant 0 : i32
    %c0_i32_0 = arith.constant 0 : i32
    %c0_i32_1 = arith.constant 0 : i32
    return %c0_i32, %c0_i32_0 : i32, i32
  }
  func.func @transform_1(%arg0: i32) -> (i32, i32) {
    %c0_i32 = arith.constant 0 : i32
    %c0_i32_0 = arith.constant 0 : i32
    %c0_i32_1 = arith.constant 0 : i32
    return %c0_i32, %c0_i32_0 : i32, i32
  }
  func.func @transform_2(%arg0: i32) -> (i32, i32) {
    %c0_i32 = arith.constant 0 : i32
    %c0_i32_0 = arith.constant 0 : i32
    %c0_i32_1 = arith.constant 0 : i32
    return %c0_i32, %c0_i32_0 : i32, i32
  }
  func.func @transform_3(%arg0: i32) -> (i32, i32) {
    %c0_i32 = arith.constant 0 : i32
    %c0_i32_0 = arith.constant 0 : i32
    %c0_i32_1 = arith.constant 0 : i32
    return %c0_i32, %c0_i32_0 : i32, i32
  }
  func.func @transform_4(%arg0: i32) -> (i32, i32) {
    %c0_i32 = arith.constant 0 : i32
    %c0_i32_0 = arith.constant 0 : i32
    %c0_i32_1 = arith.constant 0 : i32
    return %c0_i32, %c0_i32_0 : i32, i32
  }
  func.func @transform_5(%arg0: i32) -> (i32, i32) {
    %c0_i32 = arith.constant 0 : i32
    %c0_i32_0 = arith.constant 0 : i32
    %c0_i32_1 = arith.constant 0 : i32
    return %c0_i32, %c0_i32_0 : i32, i32
  }
  func.func @transform_6(%arg0: i32) -> (i32, i32) {
    %c0_i32 = arith.constant 0 : i32
    %c0_i32_0 = arith.constant 0 : i32
    %c0_i32_1 = arith.constant 0 : i32
    return %c0_i32, %c0_i32_0 : i32, i32
  }
}

</mosaic_0001>

<bundles_post_ra>
// kernel: encoder_old_forward.1
= control target key start
LH: loop header
LB: loop body
LE: loop exit
PB: predicated region body
PF: predicated region fallthrough
CT: control target
= control target key end

     0   :  { %12 = vsyncpa [#allocation3], 0  ;;  %v2405_v2 = vmov 0   ;;  %vm124_vm0 = vcmask 130048   ;;  %s4152_s0 = inlined_call_operand.vmem [shape: f32[256,16], index: 0, kind: input, shape index: {}]   ;;  %s4153_s1 = inlined_call_operand.vmem [shape: bf16[256,256], index: 1, kind: input, shape index: {}]   ;;  %s4154_s2 = inlined_call_operand.vmem [shape: bf16[16,256], index: 2, kind: input, shape index: {}]   ;;  %s4155_s3 = inlined_call_operand.vmem [shape: bf16[128,128], index: 3, kind: input, shape index: {}]   ;;  %s4156_s4 = inlined_call_operand.vmem [shape: f32[8,128], index: 4, kind: input, shape index: {}]   ;;  %s4157_s5 = inlined_call_operand.hbm [shape: f32[256,128], index: 5, kind: output, shape index: {0}]   ;;  %s4158_s6 = inlined_call_operand.hbm [shape: f32[256,128], index: 6, kind: output, shape index: {1}]  }
   0x1   :  { %v2263_v0 = vld [vmem:[%s4154_s2 + $0x4] ss:$8 sps:$4 sm:$0xff]   ;;  %v2265_v1 = vld [vmem:[%s4154_s2] ss:$8 sps:$4 sm:$0xff]   ;;  %205 = vmatprep.mubr.bf16.mxu0 %v2405_v2  ;;  %v27_v6 = vld [vmem:[%s4152_s0 + $0x10] sm:$0xff] }
   0x2   :  { %v25_v3 = vld [vmem:[%s4152_s0] sm:$0xff]  ;;  %v26_v4 = vld [vmem:[%s4152_s0 + $0x8] sm:$0xff]  ;;  %173 = vmatprep.subr.bf16.mxu0 %v2263_v0  ;;  %v28_v7 = vld [vmem:[%s4152_s0 + $0x18] sm:$0xff] }
   0x3   :  { %v57_v5 = vpack.c.bf16 %v26_v4, %v25_v3  ;;  %174 = vmatpush1.bf16.msra.mxu0 %v2265_v1  ;;  %v58_v8 = vpack.c.bf16 %v28_v7, %v27_v6  ;;  %v29_v9 = vld [vmem:[%s4152_s0 + $0x20] sm:$0xff]  ;;  %v30_v10 = vld [vmem:[%s4152_s0 + $0x28] sm:$0xff]  ;;  %v31_v12 = vld [vmem:[%s4152_s0 + $0x30] sm:$0xff] }
   0x4   :  { %v59_v11 = vpack.c.bf16 %v30_v10, %v29_v9  ;;  %v32_v13 = vld [vmem:[%s4152_s0 + $0x38] sm:$0xff] }
   0x5   :  { %v60_v14 = vpack.c.bf16 %v32_v13, %v31_v12 }
   0x6   :  { %1883 = vmatmul.mubr.msk.bf16.vlgmr.msra.gmra.mrb[0].mxu0 %vm124_vm0, %v57_v5 }
   0x7   :  { %215 = vmatprep.mubr.bf16.mxu0 %v2405_v2 }
   0xe   :  { %1884 = vmatmul.mubr.msk.bf16.gmra.mrb[4].mxu0 %vm124_vm0, %v58_v8 }
   0xf   :  { %225 = vmatprep.mubr.bf16.mxu0 %v2405_v2 }
  0x16   :  { %1885 = vmatmul.mubr.msk.bf16.gmra.mrb[8].mxu0 %vm124_vm0, %v59_v11 }
  0x17   :  { %235 = vmatprep.mubr.bf16.mxu0 %v2405_v2 }
  0x18   :  { %13 = vsyncpa [#allocation5], 0  ;;  %v33_v15 = vld [vmem:[%s4152_s0 + $0x40] sm:$0xff]  ;;  %v34_v16 = vld [vmem:[%s4152_s0 + $0x48] sm:$0xff]  ;;  %s2406_s30 = smov [#allocation2]  }
  0x19   :  { %v61_v17 = vpack.c.bf16 %v34_v16, %v33_v15  ;;  %v35_v18 = vld [vmem:[%s4152_s0 + $0x50] sm:$0xff]  ;;  %v36_v19 = vld [vmem:[%s4152_s0 + $0x58] sm:$0xff]  ;;  %v37_v21 = vld [vmem:[%s4152_s0 + $0x60] sm:$0xff]  ;;  %s1854_s7 = sshll.u32 %s2406_s30, 4  ;;  %s1855_s7 = int_to_ptr.vmem [resolvable:$true] %s1854_s7 }
  0x1a   :  { %v62_v20 = vpack.c.bf16 %v36_v19, %v35_v18  ;;  %v38_v22 = vld [vmem:[%s4152_s0 + $0x68] sm:$0xff]  ;;  %v39_v24 = vld [vmem:[%s4152_s0 + $0x70] sm:$0xff]  ;;  %v40_v25 = vld [vmem:[%s4152_s0 + $0x78] sm:$0xff]  ;;  %s2357_s8 = scalar_lea.vmem %s1855_s7, 4096  ;;  %p2362_p1 = scmp.lt.s32.totalorder %s1855_s7, %s1855_s7 }
  0x1b   :  { %v63_v23 = vpack.c.bf16 %v38_v22, %v37_v21  ;;  %v64_v26 = vpack.c.bf16 %v40_v25, %v39_v24  ;;  %v41_v27 = vld [vmem:[%s4152_s0 + $0x80] sm:$0xff]  ;;  %v42_v28 = vld [vmem:[%s4152_s0 + $0x88] sm:$0xff]  ;;  %v43_v30 = vld [vmem:[%s4152_s0 + $0x90] sm:$0xff]  ;;  %p2358_p0 = scmp.ne.s32.totalorder %s1855_s7, %s2357_s8  ;;  %p2363_p2 = scmp.lt.s32.totalorder %s2357_s8, %s2357_s8 }
  0x1c   :  { %v65_v29 = vpack.c.bf16 %v42_v28, %v41_v27  ;;  %v44_v31 = vld [vmem:[%s4152_s0 + $0x98] sm:$0xff]  ;;  %v45_v33 = vld [vmem:[%s4152_s0 + $0xa0] sm:$0xff]  ;;  %v46_v34 = vld [vmem:[%s4152_s0 + $0xa8] sm:$0xff] }
  0x1d   :  { %v66_v32 = vpack.c.bf16 %v44_v31, %v43_v30  ;;  %v67_v35 = vpack.c.bf16 %v46_v34, %v45_v33  ;;  %v47_v36 = vld [vmem:[%s4152_s0 + $0xb0] sm:$0xff]  ;;  %v48_v37 = vld [vmem:[%s4152_s0 + $0xb8] sm:$0xff]  ;;  %v49_v39 = vld [vmem:[%s4152_s0 + $0xc0] sm:$0xff]  ;;  %p2364_p3 = por %p2363_p2, %p2362_p1 }
  0x1e   :  { %1886 = vmatmul.mubr.msk.bf16.gmra.mrb[12].mxu0 %vm124_vm0, %v60_v14  ;;  %v68_v38 = vpack.c.bf16 %v48_v37, %v47_v36  ;;  %v50_v40 = vld [vmem:[%s4152_s0 + $0xc8] sm:$0xff]  ;;  %v51_v42 = vld [vmem:[%s4152_s0 + $0xd0] sm:$0xff]  ;;  %v52_v43 = vld [vmem:[%s4152_s0 + $0xd8] sm:$0xff] }
  0x1f   :  { %245 = vmatprep.mubr.bf16.mxu0 %v2405_v2  ;;  %v69_v41 = vpack.c.bf16 %v50_v40, %v49_v39  ;;  %v70_v44 = vpack.c.bf16 %v52_v43, %v51_v42  ;;  %v53_v45 = vld [vmem:[%s4152_s0 + $0xe0] sm:$0xff]  ;;  %v54_v46 = vld [vmem:[%s4152_s0 + $0xe8] sm:$0xff]  ;;  %v55_v48 = vld [vmem:[%s4152_s0 + $0xf0] sm:$0xff]  ;;  %p2365_p4 = pnand %p2364_p3, %p2358_p0 }
  0x20   :  { %v71_v47 = vpack.c.bf16 %v54_v46, %v53_v45  ;;  %v56_v49 = vld [vmem:[%s4152_s0 + $0xf8] sm:$0xff]  ;;  %v2582_v51 = vld [vmem:[%s4153_s1 + $0x4] ss:$8 sps:$4 sm:$0xff]  }
  0x21   :  { %v72_v50 = vpack.c.bf16 %v56_v49, %v55_v48  ;;  %v2271_v52 = vld [vmem:[%s4153_s1 + $0x54] ss:$8 sps:$4 sm:$0xff]  }
  0x22   :  { %654 = vmatprep.mubr.bf16.mxu1 %v2271_v52 }
  0x26   :  { %1887 = vmatmul.mubr.msk.bf16.gmra.mrb[16].mxu0 %vm124_vm0, %v61_v17 }
  0x27   :  { %255 = vmatprep.mubr.bf16.mxu0 %v2405_v2 }
  0x2e   :  { %1888 = vmatmul.mubr.msk.bf16.gmra.mrb[20].mxu0 %vm124_vm0, %v62_v20 }
  0x2f   :  { %265 = vmatprep.mubr.bf16.mxu0 %v2405_v2 }
  0x36   :  { %1889 = vmatmul.mubr.msk.bf16.gmra.mrb[24].mxu0 %vm124_vm0, %v63_v23 }
  0x37   :  { %275 = vmatprep.mubr.bf16.mxu0 %v2405_v2 }
  0x3e   :  { %1890 = vmatmul.mubr.msk.bf16.gmra.mrb[28].mxu0 %vm124_vm0, %v64_v26 }
  0x3f   :  { %285 = vmatprep.mubr.bf16.mxu0 %v2405_v2 }
  0x46   :  { %1891 = vmatmul.mubr.msk.bf16.gmra.mrb[32].mxu0 %vm124_vm0, %v65_v29 }
  0x47   :  { %295 = vmatprep.mubr.bf16.mxu0 %v2405_v2 }
  0x4e   :  { %1892 = vmatmul.mubr.msk.bf16.gmra.mrb[36].mxu0 %vm124_vm0, %v66_v32 }
  0x4f   :  { %305 = vmatprep.mubr.bf16.mxu0 %v2405_v2 }
  0x56   :  { %1893 = vmatmul.mubr.msk.bf16.gmra.mrb[40].mxu0 %vm124_vm0, %v67_v35 }
  0x57   :  { %315 = vmatprep.mubr.bf16.mxu0 %v2405_v2 }
  0x5e   :  { %1894 = vmatmul.mubr.msk.bf16.gmra.mrb[44].mxu0 %vm124_vm0, %v68_v38 }
  0x5f   :  { %325 = vmatprep.mubr.bf16.mxu0 %v2405_v2 }
  0x66   :  { %1895 = vmatmul.mubr.msk.bf16.gmra.mrb[48].mxu0 %vm124_vm0, %v69_v41 }
  0x67   :  { %335 = vmatprep.mubr.bf16.mxu0 %v2405_v2 }
  0x6e   :  { %1896 = vmatmul.mubr.msk.bf16.gmra.mrb[52].mxu0 %vm124_vm0, %v70_v44 }
  0x6f   :  { %345 = vmatprep.mubr.bf16.mxu0 %v2405_v2 }
  0x76   :  { %1897 = vmatmul.mubr.msk.bf16.gmra.mrb[56].mxu0 %vm124_vm0, %v71_v47 }
  0x77   :  { %355 = vmatprep.mubr.bf16.mxu0 %v2405_v2 }
  0x7e   :  { %1898 = vmatmul.mubr.msk.bf16.gmra.mrb[60].mxu0 %vm124_vm0, %v72_v50 }
  0x7f   :  { %614 = vmatprep.mubr.bf16.mxu0 %v2582_v51 }
  0xd9   :  { %v207_v53 = vpop.f32.mrb[0].mxu0 }
  0xda   :  { %v2588_v54 = vpop.f32.mrb[1].mxu0 }
  0xdb   :  { %v211_v55 = vpop.f32.mrb[2].mxu0 }
  0xdc   :  { %v402_v56 = vpack.c.bf16 %v211_v55, %v207_v53  ;;  %v2590_v57 = vpop.f32.mrb[3].mxu0 }
  0xe1   :  { %v217_v58 = vpop.f32.mrb[4].mxu0 }
  0xe2   :  { %v2592_v59 = vpop.f32.mrb[5].mxu0 }
  0xe3   :  { %v221_v60 = vpop.f32.mrb[6].mxu0 }
  0xe4   :  { %v403_v61 = vpack.c.bf16 %v221_v60, %v217_v58  ;;  %v2594_v62 = vpop.f32.mrb[7].mxu0 }
  0xe9   :  { %v227_v63 = vpop.f32.mrb[8].mxu0 }
  0xea   :  { %v2596_v0 = vpop.f32.mrb[9].mxu0 }
  0xeb   :  { %v231_v1 = vpop.f32.mrb[10].mxu0 }
  0xec   :  { %v404_v2 = vpack.c.bf16 %v231_v1, %v227_v63  ;;  %v2598_v3 = vpop.f32.mrb[11].mxu0 }
  0xf1   :  { %v237_v4 = vpop.f32.mrb[12].mxu0 }
  0xf2   :  { %v2600_v5 = vpop.f32.mrb[13].mxu0 }
  0xf3   :  { %v241_v6 = vpop.f32.mrb[14].mxu0 }
  0xf4   :  { %v405_v7 = vpack.c.bf16 %v241_v6, %v237_v4  ;;  %v2602_v8 = vpop.f32.mrb[15].mxu0 }
  0xf9   :  { %v247_v9 = vpop.f32.mrb[16].mxu0 }
  0xfa   :  { %v2604_v10 = vpop.f32.mrb[17].mxu0 }
  0xfb   :  { %v251_v11 = vpop.f32.mrb[18].mxu0 }
  0xfc   :  { %v406_v12 = vpack.c.bf16 %v251_v11, %v247_v9  ;;  %v2606_v13 = vpop.f32.mrb[19].mxu0 }
 0x101   :  { %v257_v14 = vpop.f32.mrb[20].mxu0 }
 0x102   :  { %v2608_v15 = vpop.f32.mrb[21].mxu0 }
 0x103   :  { %v261_v16 = vpop.f32.mrb[22].mxu0 }
 0x104   :  { %v2610_v17 = vpack.c.bf16 %v261_v16, %v257_v14  ;;  %v2612_v18 = vpop.f32.mrb[23].mxu0 }
 0x109   :  { %v267_v19 = vpop.f32.mrb[24].mxu0 }
 0x10a   :  { %v2614_v20 = vpop.f32.mrb[25].mxu0 }
 0x10b   :  { %v271_v21 = vpop.f32.mrb[26].mxu0 }
 0x10c   :  { %v2616_v22 = vpack.c.bf16 %v271_v21, %v267_v19  ;;  %v2618_v23 = vpop.f32.mrb[27].mxu0  ;;  %v2269_v19 = vld [vmem:[%s4153_s1 + $0x50] ss:$8 sps:$4 sm:$0xff]   ;;  %v2272_v21 = vld [vmem:[%s4153_s1 + $0x14] ss:$8 sps:$4 sm:$0xff]  }
 0x111   :  { %v277_v24 = vpop.f32.mrb[28].mxu0 }
 0x112   :  { %v2620_v25 = vpop.f32.mrb[29].mxu0 }
 0x113   :  { %v281_v26 = vpop.f32.mrb[30].mxu0 }
 0x114   :  { %v2622_v27 = vpack.c.bf16 %v281_v26, %v277_v24  ;;  %v2624_v28 = vpop.f32.mrb[31].mxu0  ;;  %v2276_v24 = vld [vmem:[%s4153_s1 + $0x10] ss:$8 sps:$4 sm:$0xff]   ;;  %v2277_v26 = vld [vmem:[%s4153_s1 + $0x60] ss:$8 sps:$4 sm:$0xff]  }
 0x119   :  { %v287_v29 = vpop.f32.mrb[32].mxu0 }
 0x11a   :  { %v2626_v30 = vpop.f32.mrb[33].mxu0 }
 0x11b   :  { %v291_v31 = vpop.f32.mrb[34].mxu0 }
 0x11c   :  { %v410_v32 = vpack.c.bf16 %v291_v31, %v287_v29  ;;  %v2628_v33 = vpop.f32.mrb[35].mxu0  ;;  %v2280_v29 = vld [vmem:[%s4153_s1 + $0x74] ss:$8 sps:$4 sm:$0xff]   ;;  %v2282_v31 = vld [vmem:[%s4153_s1 + $0x20] ss:$8 sps:$4 sm:$0xff]  }
 0x11e   :  { %1946 = vmatprep.subr.bf16.mxu0 %v410_v32  ;;  %2242 = vmatprep.subr.bf16.mxu1 %v410_v32  ;;  %v2283_v32 = vld [vmem:[%s4153_s1 + $0x70] ss:$8 sps:$4 sm:$0xff]  }
 0x11f   :  { %1947 = vmatpush3.bf16.msra.mxu0 %v402_v56  ;;  %2250 = vmatpush3.bf16.msra.mxu1 %v402_v56 }
 0x121   :  { %v297_v34 = vpop.f32.mrb[36].mxu0 }
 0x122   :  { %v2630_v35 = vpop.f32.mrb[37].mxu0 }
 0x123   :  { %v301_v36 = vpop.f32.mrb[38].mxu0 }
 0x124   :  { %v411_v37 = vpack.c.bf16 %v301_v36, %v297_v34  ;;  %v2632_v38 = vpop.f32.mrb[39].mxu0  ;;  %v2284_v34 = vld [vmem:[%s4153_s1 + $0x34] ss:$8 sps:$4 sm:$0xff]   ;;  %v2286_v36 = vld [vmem:[%s4153_s1 + $0x84] ss:$8 sps:$4 sm:$0xff]  }
 0x125   :  { %4183 = vst [vmem:[#allocation8_spill] sm:$0xff] %v2632_v38 }
 0x126   :  { %1948 = vmatprep.subr.bf16.mxu0 %v411_v37  ;;  %2243 = vmatprep.subr.bf16.mxu1 %v411_v37  ;;  %v2288_v37 = vld [vmem:[%s4153_s1 + $0x30] ss:$8 sps:$4 sm:$0xff]  }
 0x127   :  { %1949 = vmatpush3.bf16.msra.mxu0 %v403_v61  ;;  %2251 = vmatpush3.bf16.msra.mxu1 %v403_v61 }
 0x129   :  { %v307_v39 = vpop.f32.mrb[40].mxu0 }
 0x12a   :  { %v2634_v40 = vpop.f32.mrb[41].mxu0 }
 0x12b   :  { %4184 = vst [vmem:[#allocation9_spill] sm:$0xff] %v2634_v40  ;;  %v311_v41 = vpop.f32.mrb[42].mxu0 }
 0x12c   :  { %v412_v42 = vpack.c.bf16 %v311_v41, %v307_v39  ;;  %v2636_v43 = vpop.f32.mrb[43].mxu0  ;;  %v2289_v39 = vld [vmem:[%s4153_s1 + $0x80] ss:$8 sps:$4 sm:$0xff]   ;;  %v2290_v41 = vld [vmem:[%s4153_s1 + $0x44] ss:$8 sps:$4 sm:$0xff]  }
 0x12d   :  { %4185 = vst [vmem:[#allocation10_spill] sm:$0xff] %v2636_v43 }
 0x12e   :  { %1950 = vmatprep.subr.bf16.mxu0 %v412_v42  ;;  %2244 = vmatprep.subr.bf16.mxu1 %v412_v42  ;;  %v2292_v42 = vld [vmem:[%s4153_s1 + $0x94] ss:$8 sps:$4 sm:$0xff]  }
 0x12f   :  { %1951 = vmatpush3.bf16.msra.mxu0 %v404_v2  ;;  %2252 = vmatpush3.bf16.msra.mxu1 %v404_v2 }
 0x131   :  { %v317_v44 = vpop.f32.mrb[44].mxu0 }
 0x132   :  { %v2638_v45 = vpop.f32.mrb[45].mxu0 }
 0x133   :  { %4186 = vst [vmem:[#allocation11_spill] sm:$0xff] %v2638_v45  ;;  %v321_v46 = vpop.f32.mrb[46].mxu0 }
 0x134   :  { %v413_v47 = vpack.c.bf16 %v321_v46, %v317_v44  ;;  %v2640_v48 = vpop.f32.mrb[47].mxu0  ;;  %v2294_v44 = vld [vmem:[%s4153_s1 + $0x40] ss:$8 sps:$4 sm:$0xff]   ;;  %v2295_v46 = vld [vmem:[%s4153_s1 + $0x90] ss:$8 sps:$4 sm:$0xff]  }
 0x135   :  { %4187 = vst [vmem:[#allocation12_spill] sm:$0xff] %v2640_v48 }
 0x136   :  { %1952 = vmatprep.subr.bf16.mxu0 %v413_v47  ;;  %2245 = vmatprep.subr.bf16.mxu1 %v413_v47  ;;  %v2296_v47 = vld [vmem:[%s4153_s1 + $0xa4] ss:$8 sps:$4 sm:$0xff]  }
 0x137   :  { %1953 = vmatpush3.bf16.msra.mxu0 %v405_v7  ;;  %2253 = vmatpush3.bf16.msra.mxu1 %v405_v7 }
 0x139   :  { %v327_v49 = vpop.f32.mrb[48].mxu0 }
 0x13a   :  { %v2642_v50 = vpop.f32.mrb[49].mxu0 }
 0x13b   :  { %4188 = vst [vmem:[#allocation13_spill] sm:$0xff] %v2642_v50  ;;  %v331_v52 = vpop.f32.mrb[50].mxu0 }
 0x13c   :  { %v414_v53 = vpack.c.bf16 %v331_v52, %v327_v49  ;;  %v2644_v55 = vpop.f32.mrb[51].mxu0  ;;  %v2298_v49 = vld [vmem:[%s4153_s1 + $0xa0] ss:$8 sps:$4 sm:$0xff]   ;;  %v2299_v52 = vld [vmem:[%s4153_s1 + $0xb4] ss:$8 sps:$4 sm:$0xff]  }
 0x13d   :  { %4189 = vst [vmem:[#allocation14_spill] sm:$0xff] %v2644_v55 }
 0x13e   :  { %1954 = vmatprep.subr.bf16.mxu0 %v414_v53  ;;  %2246 = vmatprep.subr.bf16.mxu1 %v414_v53  ;;  %v2301_v53 = vld [vmem:[%s4153_s1 + $0xb0] ss:$8 sps:$4 sm:$0xff]  }
 0x13f   :  { %1955 = vmatpush3.bf16.msra.mxu0 %v406_v12  ;;  %2254 = vmatpush3.bf16.msra.mxu1 %v406_v12 }
 0x141   :  { %v337_v56 = vpop.f32.mrb[52].mxu0 }
 0x142   :  { %v2646_v58 = vpop.f32.mrb[53].mxu0 }
 0x143   :  { %4190 = vst [vmem:[#allocation15_spill] sm:$0xff] %v2646_v58  ;;  %v341_v60 = vpop.f32.mrb[54].mxu0 }
 0x144   :  { %v415_v61 = vpack.c.bf16 %v341_v60, %v337_v56  ;;  %v2648_v63 = vpop.f32.mrb[55].mxu0  ;;  %v2302_v56 = vld [vmem:[%s4153_s1 + $0xc4] ss:$8 sps:$4 sm:$0xff]   ;;  %v2304_v60 = vld [vmem:[%s4153_s1 + $0xc0] ss:$8 sps:$4 sm:$0xff]  }
 0x145   :  { %4191 = vst [vmem:[#allocation16_spill] sm:$0xff] %v2648_v63 }
 0x146   :  { %1956 = vmatprep.subr.bf16.mxu0 %v415_v61  ;;  %2247 = vmatprep.subr.bf16.mxu1 %v415_v61  ;;  %v2305_v61 = vld [vmem:[%s4153_s1 + $0xd4] ss:$8 sps:$4 sm:$0xff]  }
 0x147   :  { %1957 = vmatpush3.bf16.msra.mxu0 %v2610_v17  ;;  %2255 = vmatpush3.bf16.msra.mxu1 %v2610_v17  ;;  %v2266_v17 = vld [vmem:[%s4153_s1] ss:$8 sps:$4 sm:$0xff]  }
 0x149   :  { %v347_v1 = vpop.f32.mrb[56].mxu0 }
 0x14a   :  { %v2652_v2 = vpop.f32.mrb[57].mxu0 }
 0x14b   :  { %4192 = vst [vmem:[#allocation17_spill] sm:$0xff] %v2652_v2  ;;  %v351_v4 = vpop.f32.mrb[58].mxu0 }
 0x14c   :  { %v416_v6 = vpack.c.bf16 %v351_v4, %v347_v1  ;;  %v2654_v7 = vpop.f32.mrb[59].mxu0  ;;  %v2307_v1 = vld [vmem:[%s4153_s1 + $0xd0] ss:$8 sps:$4 sm:$0xff]   ;;  %v2308_v4 = vld [vmem:[%s4153_s1 + $0xe4] ss:$8 sps:$4 sm:$0xff]  }
 0x14d   :  { %4193 = vst [vmem:[#allocation18_spill] sm:$0xff] %v2654_v7 }
 0x14e   :  { %1958 = vmatprep.subr.bf16.mxu0 %v416_v6  ;;  %2248 = vmatprep.subr.bf16.mxu1 %v416_v6  ;;  %v2310_v6 = vld [vmem:[%s4153_s1 + $0xe0] ss:$8 sps:$4 sm:$0xff]  }
 0x14f   :  { %1959 = vmatpush3.bf16.msra.mxu0 %v2616_v22  ;;  %2256 = vmatpush3.bf16.msra.mxu1 %v2616_v22  ;;  %v2274_v22 = vld [vmem:[%s4153_s1 + $0x64] ss:$8 sps:$4 sm:$0xff]  }
 0x151   :  { %v357_v9 = vpop.f32.mrb[60].mxu0 }
 0x152   :  { %v2658_v11 = vpop.f32.mrb[61].mxu0 }
 0x153   :  { %4194 = vst [vmem:[#allocation19_spill] sm:$0xff] %v2658_v11  ;;  %v361_v12 = vpop.f32.mrb[62].mxu0 }
 0x154   :  { %v417_v14 = vpack.c.bf16 %v361_v12, %v357_v9  ;;  %v2660_v16 = vpop.f32.mrb[63].mxu0  ;;  %v2311_v9 = vld [vmem:[%s4153_s1 + $0xf4] ss:$8 sps:$4 sm:$0xff]   ;;  %v2313_v12 = vld [vmem:[%s4153_s1 + $0xf0] ss:$8 sps:$4 sm:$0xff]  }
 0x155   :  { %4195 = vst [vmem:[#allocation20_spill] sm:$0xff] %v2660_v16 }
 0x156   :  { %1960 = vmatprep.subr.bf16.mxu0 %v417_v14  ;;  %2249 = vmatprep.subr.bf16.mxu1 %v417_v14 }
 0x157   :  { %1961 = vmatpush3.bf16.msra.mxu0 %v2622_v27  ;;  %2257 = vmatpush3.bf16.msra.mxu1 %v2622_v27  ;;  %v2278_v27 = vld [vmem:[%s4153_s1 + $0x24] ss:$8 sps:$4 sm:$0xff]  }
 0x15a   :  { %615 = vmatmul.mubr.bf16.vlgmr.msra.gmra.mrb[64].mxu0 %v2266_v17  ;;  %655 = vmatmul.mubr.bf16.vlgmr.msra.gmra.mrb[0].mxu1 %v2269_v19 }
 0x15b   :  { %622 = vmatprep.mubr.bf16.mxu0 %v2272_v21  ;;  %662 = vmatprep.mubr.bf16.mxu1 %v2274_v22 }
 0x162   :  { %623 = vmatmul.mubr.bf16.gmra.mrb[68].mxu0 %v2276_v24  ;;  %663 = vmatmul.mubr.bf16.gmra.mrb[4].mxu1 %v2277_v26 }
 0x163   :  { %630 = vmatprep.mubr.bf16.mxu0 %v2278_v27  ;;  %670 = vmatprep.mubr.bf16.mxu1 %v2280_v29 }
 0x16a   :  { %631 = vmatmul.mubr.bf16.gmra.mrb[72].mxu0 %v2282_v31  ;;  %671 = vmatmul.mubr.bf16.gmra.mrb[8].mxu1 %v2283_v32 }
 0x16b   :  { %638 = vmatprep.mubr.bf16.mxu0 %v2284_v34  ;;  %678 = vmatprep.mubr.bf16.mxu1 %v2286_v36 }
 0x172   :  { %639 = vmatmul.mubr.bf16.gmra.mrb[76].mxu0 %v2288_v37  ;;  %679 = vmatmul.mubr.bf16.gmra.mrb[12].mxu1 %v2289_v39 }
 0x173   :  { %646 = vmatprep.mubr.bf16.mxu0 %v2290_v41  ;;  %686 = vmatprep.mubr.bf16.mxu1 %v2292_v42 }
 0x17a   :  { %647 = vmatmul.mubr.bf16.gmra.mrb[80].mxu0 %v2294_v44  ;;  %687 = vmatmul.mubr.bf16.gmra.mrb[16].mxu1 %v2295_v46 }
 0x17b   :  { %694 = vmatprep.mubr.bf16.mxu1 %v2296_v47 }
 0x182   :  { %695 = vmatmul.mubr.bf16.gmra.mrb[20].mxu1 %v2298_v49 }
 0x183   :  { %702 = vmatprep.mubr.bf16.mxu1 %v2299_v52 }
 0x18a   :  { %703 = vmatmul.mubr.bf16.gmra.mrb[24].mxu1 %v2301_v53 }
 0x18b   :  { %710 = vmatprep.mubr.bf16.mxu1 %v2302_v56  ;;  %v2766_v56 = vld [vmem:[%s4156_s4] ss:$0 sm:$0xff] }
 0x192   :  { %711 = vmatmul.mubr.bf16.gmra.mrb[28].mxu1 %v2304_v60 }
 0x193   :  { %718 = vmatprep.mubr.bf16.mxu1 %v2305_v61 }
 0x19a   :  { %719 = vmatmul.mubr.bf16.gmra.mrb[32].mxu1 %v2307_v1 }
 0x19b   :  { %726 = vmatprep.mubr.bf16.mxu1 %v2308_v4 }
 0x1a2   :  { %727 = vmatmul.mubr.bf16.gmra.mrb[36].mxu1 %v2310_v6 }
 0x1a3   :  { %734 = vmatprep.mubr.bf16.mxu1 %v2311_v9 }
 0x1aa   :  { %735 = vmatmul.mubr.bf16.gmra.mrb[40].mxu1 %v2313_v12 }
 0x1ab   :  { %1378 = vmatprep.mubr.bf16.mxu1 %v2582_v51 }
 0x22d   :  { %v1992_v14 = vpop.f32.mrb[0].mxu1  ;;  %v1962_v17 = vpop.f32.mrb[64].mxu0 }
 0x22e   :  { %v1993_v19 = vpop.f32.mrb[1].mxu1  ;;  %v1963_v21 = vpop.f32.mrb[65].mxu0 }
 0x22f   :  { %v2755_v22 = vadd.f32 %v1993_v19, %v1992_v14  ;;  %v1995_v24 = vpop.f32.mrb[2].mxu1  ;;  %v1964_v26 = vadd.f32 %v1963_v21, %v1962_v17  ;;  %v1965_v27 = vpop.f32.mrb[66].mxu0 }
 0x230   :  { %v1996_v29 = vpop.f32.mrb[3].mxu1  ;;  %v1966_v31 = vpop.f32.mrb[67].mxu0 }
 0x231   :  { %v2757_v32 = vadd.f32 %v1996_v29, %v1995_v24  ;;  %v1967_v34 = vadd.f32 %v1966_v31, %v1965_v27  ;;  %v2769_v60 = vadd.f32 %v1964_v26, %v2766_v56 }
 0x233   :  { %v2772_v61 = vadd.f32 %v1967_v34, %v2766_v56 }
 0x235   :  { %v1968_v36 = vpop.f32.mrb[68].mxu0  ;;  %v1998_v37 = vpop.f32.mrb[4].mxu1  ;;  %v743_v14 = vadd.f32 %v2772_v61, %v2769_v60 }
 0x236   :  { %v1969_v39 = vpop.f32.mrb[69].mxu0  ;;  %v1999_v41 = vpop.f32.mrb[5].mxu1 }
 0x237   :  { %v1970_v42 = vadd.f32 %v1969_v39, %v1968_v36  ;;  %v2759_v51 = vadd.f32 %v1999_v41, %v1998_v37  ;;  %v1971_v44 = vpop.f32.mrb[70].mxu0  ;;  %v2001_v46 = vpop.f32.mrb[6].mxu1 }
 0x238   :  { %v1972_v47 = vpop.f32.mrb[71].mxu0  ;;  %v2002_v49 = vpop.f32.mrb[7].mxu1 }
 0x239   :  { %v1973_v52 = vadd.f32 %v1972_v47, %v1971_v44  ;;  %v2761_v53 = vadd.f32 %v2002_v49, %v2001_v46  ;;  %v2775_v1 = vadd.f32 %v1970_v42, %v2766_v56 }
 0x23b   :  { %v744_v29 = vadd.f32 %v743_v14, %v2775_v1  ;;  %v2781_v31 = vadd.f32 %v1973_v52, %v2766_v56 }
 0x23d   :  { %v1974_v4 = vpop.f32.mrb[72].mxu0  ;;  %v2004_v6 = vpop.f32.mrb[8].mxu1  ;;  %v745_v39 = vadd.f32 %v744_v29, %v2781_v31 }
 0x23e   :  { %v1975_v9 = vpop.f32.mrb[73].mxu0  ;;  %v2005_v12 = vpop.f32.mrb[9].mxu1 }
 0x23f   :  { %v1976_v17 = vadd.f32 %v1975_v9, %v1974_v4  ;;  %v1977_v19 = vpop.f32.mrb[74].mxu0  ;;  %v2006_v21 = vadd.f32 %v2005_v12, %v2004_v6  ;;  %v2007_v24 = vpop.f32.mrb[10].mxu1 }
 0x240   :  { %v1978_v27 = vpop.f32.mrb[75].mxu0  ;;  %v2008_v26 = vpop.f32.mrb[11].mxu1 }
 0x241   :  { %v1979_v34 = vadd.f32 %v1978_v27, %v1977_v19  ;;  %v2009_v36 = vadd.f32 %v2008_v26, %v2007_v24  ;;  %v2784_v37 = vadd.f32 %v1976_v17, %v2766_v56 }
 0x243   :  { %v746_v47 = vadd.f32 %v745_v39, %v2784_v37  ;;  %v2789_v49 = vadd.f32 %v1979_v34, %v2766_v56 }
 0x245   :  { %v1980_v41 = vpop.f32.mrb[76].mxu0  ;;  %v2010_v42 = vpop.f32.mrb[12].mxu1  ;;  %v747_v27 = vadd.f32 %v746_v47, %v2789_v49 }
 0x246   :  { %v1981_v44 = vpop.f32.mrb[77].mxu0  ;;  %v2011_v46 = vpop.f32.mrb[13].mxu1 }
 0x247   :  { %v1982_v4 = vadd.f32 %v1981_v44, %v1980_v41  ;;  %v1983_v6 = vpop.f32.mrb[78].mxu0  ;;  %v2012_v52 = vadd.f32 %v2011_v46, %v2010_v42  ;;  %v2013_v9 = vpop.f32.mrb[14].mxu1 }
 0x248   :  { %v1984_v12 = vpop.f32.mrb[79].mxu0  ;;  %v2014_v14 = vpop.f32.mrb[15].mxu1 }
 0x249   :  { %v2792_v17 = vadd.f32 %v1982_v4, %v2766_v56  ;;  %v1985_v19 = vadd.f32 %v1984_v12, %v1983_v6  ;;  %v2015_v24 = vadd.f32 %v2014_v14, %v2013_v9 }
 0x24b   :  { %v748_v26 = vadd.f32 %v747_v27, %v2792_v17  ;;  %v2797_v29 = vadd.f32 %v1985_v19, %v2766_v56  ;;  %v2809_v27 = vadd.f32 %v2755_v22, %v2766_v56 }
 0x24d   :  { %v1986_v34 = vpop.f32.mrb[80].mxu0  ;;  %v2016_v39 = vpop.f32.mrb[16].mxu1  ;;  %v749_v6 = vadd.f32 %v748_v26, %v2797_v29  ;;  %v2814_v26 = vadd.f32 %v2757_v32, %v2766_v56  ;;  %v2828_v32 = vadd.f32 %v2006_v21, %v2766_v56  ;;  %v2840_v21 = vadd.f32 %v2015_v24, %v2766_v56 }
 0x24e   :  { %v1987_v41 = vpop.f32.mrb[81].mxu0  ;;  %v2017_v44 = vpop.f32.mrb[17].mxu1 }
 0x24f   :  { %v1988_v42 = vadd.f32 %v1987_v41, %v1986_v34  ;;  %v1989_v46 = vpop.f32.mrb[82].mxu0  ;;  %v2018_v16 = vadd.f32 %v2017_v44, %v2016_v39  ;;  %v2019_v11 = vpop.f32.mrb[18].mxu1 }
 0x250   :  { %v1990_v7 = vpop.f32.mrb[83].mxu0  ;;  %v2020_v4 = vpop.f32.mrb[19].mxu1 }
 0x251   :  { %v2801_v9 = vadd.f32 %v1988_v42, %v2766_v56  ;;  %v1991_v47 = vadd.f32 %v1990_v7, %v1989_v46  ;;  %v2021_v12 = vadd.f32 %v2020_v4, %v2019_v11  ;;  %v2819_v46 = vadd.f32 %v2759_v51, %v2766_v56 }
 0x252   :  { %v2844_v63 = vadd.f32 %v2018_v16, %v2766_v56 }
 0x253   :  { %v750_v14 = vadd.f32 %v749_v6, %v2801_v9  ;;  %v2805_v19 = vadd.f32 %v1991_v47, %v2766_v56  ;;  %v2824_v6 = vadd.f32 %v2761_v53, %v2766_v56  ;;  %v2836_v53 = vadd.f32 %v2012_v52, %v2766_v56 }
 0x254   :  { %v2849_v52 = vadd.f32 %v2021_v12, %v2766_v56 }
 0x255   :  { %v751_v34 = vadd.f32 %v750_v14, %v2805_v19  ;;  %v2022_v39 = vpop.f32.mrb[20].mxu1 }
 0x256   :  { %v2023_v41 = vpop.f32.mrb[21].mxu1 }
 0x257   :  { %v752_v7 = vadd.f32 %v751_v34, %v2809_v27  ;;  %v2024_v11 = vadd.f32 %v2023_v41, %v2022_v39  ;;  %v2025_v44 = vpop.f32.mrb[22].mxu1  ;;  %v2832_v41 = vadd.f32 %v2009_v36, %v2766_v56 }
 0x258   :  { %v2026_v42 = vpop.f32.mrb[23].mxu1 }
 0x259   :  { %v753_v22 = vadd.f32 %v752_v7, %v2814_v26  ;;  %v2027_v4 = vadd.f32 %v2026_v42, %v2025_v44 }
 0x25b   :  { %v754_v47 = vadd.f32 %v753_v22, %v2819_v46 }
 0x25d   :  { %v755_v14 = vadd.f32 %v754_v47, %v2824_v6  ;;  %v2028_v34 = vpop.f32.mrb[24].mxu1 }
 0x25e   :  { %v2029_v39 = vpop.f32.mrb[25].mxu1 }
 0x25f   :  { %v756_v51 = vadd.f32 %v755_v14, %v2828_v32  ;;  %v2030_v7 = vadd.f32 %v2029_v39, %v2028_v34  ;;  %v2031_v44 = vpop.f32.mrb[26].mxu1 }
 0x260   :  { %v2032_v42 = vpop.f32.mrb[27].mxu1 }
 0x261   :  { %v757_v22 = vadd.f32 %v756_v51, %v2832_v41  ;;  %v2033_v2 = vadd.f32 %v2032_v42, %v2031_v44  ;;  %v2853_v42 = vadd.f32 %v2024_v11, %v2766_v56 }
 0x263   :  { %v758_v47 = vadd.f32 %v757_v22, %v2836_v53 }
 0x265   :  { %v759_v36 = vadd.f32 %v758_v47, %v2840_v21  ;;  %v2034_v14 = vpop.f32.mrb[28].mxu1  ;;  %v2857_v47 = vadd.f32 %v2027_v4, %v2766_v56 }
 0x266   :  { %v2035_v34 = vpop.f32.mrb[29].mxu1 }
 0x267   :  { %v760_v39 = vadd.f32 %v759_v36, %v2844_v63  ;;  %v2036_v58 = vadd.f32 %v2035_v34, %v2034_v14  ;;  %v2037_v51 = vpop.f32.mrb[30].mxu1  ;;  %v2861_v36 = vadd.f32 %v2030_v7, %v2766_v56 }
 0x268   :  { %v2038_v44 = vpop.f32.mrb[31].mxu1 }
 0x269   :  { %v761_v24 = vadd.f32 %v760_v39, %v2849_v52  ;;  %v2039_v22 = vadd.f32 %v2038_v44, %v2037_v51  ;;  %v2865_v39 = vadd.f32 %v2033_v2, %v2766_v56  ;;  %v2869_v4 = vadd.f32 %v2036_v58, %v2766_v56 }
 0x26b   :  { %v762_v16 = vadd.f32 %v761_v24, %v2853_v42  ;;  %v2873_v7 = vadd.f32 %v2039_v22, %v2766_v56 }
 0x26d   :  { %v763_v55 = vadd.f32 %v762_v16, %v2857_v47  ;;  %v2040_v12 = vpop.f32.mrb[32].mxu1 }
 0x26e   :  { %v2041_v14 = vpop.f32.mrb[33].mxu1 }
 0x26f   :  { %v764_v34 = vadd.f32 %v763_v55, %v2861_v36  ;;  %v2042_v11 = vadd.f32 %v2041_v14, %v2040_v12  ;;  %v2043_v50 = vpop.f32.mrb[34].mxu1 }
 0x270   :  { %v2044_v51 = vpop.f32.mrb[35].mxu1 }
 0x271   :  { %v765_v44 = vadd.f32 %v764_v34, %v2865_v39  ;;  %v2045_v24 = vadd.f32 %v2044_v51, %v2043_v50  ;;  %v2877_v55 = vadd.f32 %v2042_v11, %v2766_v56 }
 0x273   :  { %v766_v16 = vadd.f32 %v765_v44, %v2869_v4  ;;  %v2881_v34 = vadd.f32 %v2045_v24, %v2766_v56 }
 0x275   :  { %v767_v48 = vadd.f32 %v766_v16, %v2873_v7  ;;  %v2046_v2 = vpop.f32.mrb[36].mxu1 }
 0x276   :  { %v2047_v12 = vpop.f32.mrb[37].mxu1 }
 0x277   :  { %v768_v14 = vadd.f32 %v767_v48, %v2877_v55  ;;  %v2048_v58 = vadd.f32 %v2047_v12, %v2046_v2  ;;  %v2049_v45 = vpop.f32.mrb[38].mxu1  ;;  %v2314_v48 = vld [vmem:[%s4155_s3] sm:$0xff]  }
 0x278   :  { %v2050_v50 = vpop.f32.mrb[39].mxu1  ;;  %2194 = vmatprep.subr.bf16.mxu0 %v2314_v48 }
 0x279   :  { %v769_v51 = vadd.f32 %v768_v14, %v2881_v34  ;;  %v2885_v22 = vadd.f32 %v2048_v58, %v2766_v56  ;;  %v2051_v44 = vadd.f32 %v2050_v50, %v2049_v45  ;;  %2195 = vmatpush3.bf16.msra.mxu0 %v2314_v48  ;;  %v2315_v45 = vld [vmem:[%s4155_s3 + $0x8] sm:$0xff]  }
 0x27a   :  { %2196 = vmatprep.subr.bf16.mxu0 %v2315_v45 }
 0x27b   :  { %v770_v16 = vadd.f32 %v769_v51, %v2885_v22  ;;  %v732_v11 = vadd.f32 %v2051_v44, %v2766_v56 }
 0x27d   :  { %v771_v43 = vadd.f32 %v770_v16, %v732_v11  ;;  %v2052_v24 = vpop.f32.mrb[40].mxu1  ;;  %2197 = vmatpush3.bf16.msra.mxu0 %v2315_v45  ;;  %v2316_v16 = vld [vmem:[%s4155_s3 + $0x10] sm:$0xff]  }
 0x27e   :  { %v2053_v40 = vpop.f32.mrb[41].mxu1  ;;  %2198 = vmatprep.subr.bf16.mxu0 %v2316_v16 }
 0x27f   :  { %v2054_v2 = vadd.f32 %v2053_v40, %v2052_v24  ;;  %v2055_v12 = vpop.f32.mrb[42].mxu1  ;;  %v2317_v24 = vld [vmem:[%s4155_s3 + $0x18] sm:$0xff]  }
 0x280   :  { %v2056_v14 = vpop.f32.mrb[43].mxu1 }
 0x281   :  { %v737_v58 = vadd.f32 %v2054_v2, %v2766_v56  ;;  %v2057_v50 = vadd.f32 %v2056_v14, %v2055_v12  ;;  %2199 = vmatpush3.bf16.msra.mxu0 %v2316_v16  ;;  %v2319_v14 = vld [vmem:[%s4155_s3 + $0x28] sm:$0xff]  }
 0x282   :  { %2200 = vmatprep.subr.bf16.mxu0 %v2317_v24 }
 0x283   :  { %v772_v51 = vadd.f32 %v771_v43, %v737_v58  ;;  %v740_v44 = vadd.f32 %v2057_v50, %v2766_v56  ;;  %v2318_v43 = vld [vmem:[%s4155_s3 + $0x20] sm:$0xff]  }
 0x285   :  { %v773_v40 = vadd.f32 %v772_v51, %v740_v44  ;;  %2201 = vmatpush3.bf16.msra.mxu0 %v2317_v24  ;;  %v2320_v51 = vld [vmem:[%s4155_s3 + $0x30] sm:$0xff]  }
 0x286   :  { %2202 = vmatprep.subr.bf16.mxu0 %v2318_v43 }
 0x287   :  { %v774_v48 = vrot.slane %v773_v40, 4 }
 0x289   :  { %v775_v38 = vadd.f32 %v774_v48, %v773_v40  ;;  %2203 = vmatpush3.bf16.msra.mxu0 %v2318_v43 }
 0x28a   :  { %2204 = vmatprep.subr.bf16.mxu0 %v2319_v14 }
 0x28b   :  { %v776_v2 = vrot.slane %v775_v38, 2 }
 0x28d   :  { %v777_v56 = vadd.f32 %v776_v2, %v775_v38  ;;  %2205 = vmatpush3.bf16.msra.mxu0 %v2319_v14 }
 0x28e   :  { %2206 = vmatprep.subr.bf16.mxu0 %v2320_v51 }
 0x28f   :  { %v778_v12 = vrot.slane %v777_v56, 1 }
 0x291   :  { %v779_v45 = vadd.f32 %v778_v12, %v777_v56  ;;  %2207 = vmatpush3.bf16.msra.mxu0 %v2320_v51 }
 0x293   :  { %v780_v50 = vmul.f32 0.00390625, %v779_v45 }
 0x295   :  { %v2913_v16 = vsub.f32 %v2809_v27, %v780_v50  ;;  %v2916_v38 = vsub.f32 %v2814_v26, %v780_v50  ;;  %v2919_v40 = vsub.f32 %v2819_v46, %v780_v50  ;;  %v2922_v48 = vsub.f32 %v2824_v6, %v780_v50  ;;  %v2321_v27 = vld [vmem:[%s4155_s3 + $0x38] sm:$0xff]  }
 0x296   :  { %v2925_v24 = vsub.f32 %v2828_v32, %v780_v50  ;;  %v2928_v2 = vsub.f32 %v2832_v41, %v780_v50  ;;  %v2934_v26 = vsub.f32 %v2836_v53, %v780_v50  ;;  %v2937_v43 = vsub.f32 %v2840_v21, %v780_v50  ;;  %2208 = vmatprep.subr.bf16.mxu0 %v2321_v27 }
 0x297   :  { %v2940_v46 = vsub.f32 %v2844_v63, %v780_v50  ;;  %v2943_v6 = vsub.f32 %v2849_v52, %v780_v50  ;;  %v2946_v32 = vsub.f32 %v2853_v42, %v780_v50  ;;  %v2949_v41 = vsub.f32 %v2857_v47, %v780_v50  ;;  %2209 = vmatpush3.bf16.msra.mxu0 %v2321_v27 }
 0x298   :  { %4196 = vst [vmem:[#allocation21_spill] sm:$0xff] %v2937_v43  ;;  %v2952_v56 = vsub.f32 %v2861_v36, %v780_v50  ;;  %v2955_v53 = vsub.f32 %v2865_v39, %v780_v50  ;;  %v2958_v21 = vsub.f32 %v2869_v4, %v780_v50  ;;  %v2961_v63 = vsub.f32 %v2873_v7, %v780_v50 }
 0x299   :  { %4197 = vst [vmem:[#allocation22_spill] sm:$0xff] %v2940_v46  ;;  %4198 = vst [vmem:[#allocation23_spill] sm:$0xff] %v2943_v6  ;;  %v2964_v52 = vsub.f32 %v2877_v55, %v780_v50  ;;  %v2967_v42 = vsub.f32 %v2881_v34, %v780_v50  ;;  %v2970_v47 = vsub.f32 %v2885_v22, %v780_v50 }
 0x29a   :  { %v2972_v36 = vsub.f32 %v732_v11, %v780_v50  ;;  %v2974_v39 = vsub.f32 %v737_v58, %v780_v50  ;;  %v2976_v12 = vsub.f32 %v740_v44, %v780_v50  ;;  %v2979_v4 = vsub.f32 %v2769_v60, %v780_v50 }
 0x29b   :  { %v2982_v7 = vsub.f32 %v2772_v61, %v780_v50  ;;  %v2985_v55 = vsub.f32 %v2775_v1, %v780_v50  ;;  %v2992_v11 = vsub.f32 %v2781_v31, %v780_v50  ;;  %v2995_v58 = vsub.f32 %v2784_v37, %v780_v50 }
 0x29c   :  { %v813_v34 = vmul.f32 %v2979_v4, %v2979_v4  ;;  %v3000_v44 = vsub.f32 %v2789_v49, %v780_v50  ;;  %v3005_v45 = vsub.f32 %v2792_v17, %v780_v50  ;;  %v3010_v37 = vsub.f32 %v2797_v29, %v780_v50 }
 0x29d   :  { %v814_v22 = vmul.f32 %v2982_v7, %v2982_v7  ;;  %v815_v60 = vmul.f32 %v2985_v55, %v2985_v55  ;;  %v816_v1 = vmul.f32 %v2992_v11, %v2992_v11  ;;  %v817_v31 = vmul.f32 %v2995_v58, %v2995_v58 }
 0x29e   :  { %4199 = vst [vmem:[#allocation24_spill] sm:$0xff] %v3005_v45  ;;  %v818_v27 = vmul.f32 %v3000_v44, %v3000_v44  ;;  %v3015_v49 = vsub.f32 %v2801_v9, %v780_v50  ;;  %v3020_v17 = vsub.f32 %v2805_v19, %v780_v50  ;;  %v824_v19 = vmul.f32 %v2916_v38, %v2916_v38 }
 0x29f   :  { %v845_v61 = vadd.f32 %v814_v22, %v813_v34  ;;  %v819_v22 = vmul.f32 %v3005_v45, %v3005_v45 }
 0x2a0   :  { %v821_v29 = vmul.f32 %v3015_v49, %v3015_v49 }
 0x2a1   :  { %v846_v14 = vadd.f32 %v845_v61, %v815_v60  ;;  %v820_v61 = vmul.f32 %v3010_v37, %v3010_v37 }
 0x2a3   :  { %v847_v51 = vadd.f32 %v846_v14, %v816_v1 }
 0x2a5   :  { %v848_v34 = vadd.f32 %v847_v51, %v817_v31  ;;  %v822_v31 = vmul.f32 %v3020_v17, %v3020_v17  ;;  %v823_v51 = vmul.f32 %v2913_v16, %v2913_v16 }
 0x2a7   :  { %v849_v60 = vadd.f32 %v848_v34, %v818_v27  ;;  %v825_v27 = vmul.f32 %v2919_v40, %v2919_v40 }
 0x2a9   :  { %v850_v1 = vadd.f32 %v849_v60, %v819_v22  ;;  %v826_v22 = vmul.f32 %v2922_v48, %v2922_v48 }
 0x2ab   :  { %v851_v14 = vadd.f32 %v850_v1, %v820_v61  ;;  %v827_v61 = vmul.f32 %v2925_v24, %v2925_v24 }
 0x2ad   :  { %v852_v9 = vadd.f32 %v851_v14, %v821_v29  ;;  %v828_v29 = vmul.f32 %v2928_v2, %v2928_v2 }
 0x2af   :  { %v853_v45 = vadd.f32 %v852_v9, %v822_v31  ;;  %v829_v31 = vmul.f32 %v2934_v26, %v2934_v26  ;;  %v830_v9 = vmul.f32 %v2937_v43, %v2937_v43 }
 0x2b1   :  { %v854_v50 = vadd.f32 %v853_v45, %v823_v51 }
 0x2b3   :  { %v855_v34 = vadd.f32 %v854_v50, %v824_v19  ;;  %v831_v19 = vmul.f32 %v2940_v46, %v2940_v46 }
 0x2b5   :  { %v856_v60 = vadd.f32 %v855_v34, %v825_v27  ;;  %v832_v27 = vmul.f32 %v2943_v6, %v2943_v6 }
 0x2b7   :  { %v857_v1 = vadd.f32 %v856_v60, %v826_v22  ;;  %v833_v22 = vmul.f32 %v2946_v32, %v2946_v32 }
 0x2b9   :  { %v858_v14 = vadd.f32 %v857_v1, %v827_v61  ;;  %v834_v61 = vmul.f32 %v2949_v41, %v2949_v41 }
 0x2bb   :  { %v859_v45 = vadd.f32 %v858_v14, %v828_v29  ;;  %v835_v29 = vmul.f32 %v2952_v56, %v2952_v56 }
 0x2bd   :  { %v860_v51 = vadd.f32 %v859_v45, %v829_v31  ;;  %v836_v31 = vmul.f32 %v2955_v53, %v2955_v53 }
 0x2bf   :  { %v861_v50 = vadd.f32 %v860_v51, %v830_v9  ;;  %v837_v9 = vmul.f32 %v2958_v21, %v2958_v21 }
 0x2c1   :  { %v862_v34 = vadd.f32 %v861_v50, %v831_v19  ;;  %v838_v19 = vmul.f32 %v2961_v63, %v2961_v63 }
 0x2c3   :  { %v863_v60 = vadd.f32 %v862_v34, %v832_v27  ;;  %v839_v27 = vmul.f32 %v2964_v52, %v2964_v52 }
 0x2c5   :  { %v864_v1 = vadd.f32 %v863_v60, %v833_v22  ;;  %v840_v22 = vmul.f32 %v2967_v42, %v2967_v42 }
 0x2c7   :  { %v865_v14 = vadd.f32 %v864_v1, %v834_v61  ;;  %v841_v61 = vmul.f32 %v2970_v47, %v2970_v47 }
 0x2c9   :  { %v866_v45 = vadd.f32 %v865_v14, %v835_v29  ;;  %v842_v29 = vmul.f32 %v2972_v36, %v2972_v36 }
 0x2cb   :  { %v867_v51 = vadd.f32 %v866_v45, %v836_v31  ;;  %v843_v31 = vmul.f32 %v2974_v39, %v2974_v39 }
 0x2cd   :  { %v868_v50 = vadd.f32 %v867_v51, %v837_v9  ;;  %v844_v9 = vmul.f32 %v2976_v12, %v2976_v12 }
 0x2cf   :  { %v869_v34 = vadd.f32 %v868_v50, %v838_v19 }
 0x2d1   :  { %v870_v60 = vadd.f32 %v869_v34, %v839_v27 }
 0x2d3   :  { %v871_v1 = vadd.f32 %v870_v60, %v840_v22 }
 0x2d5   :  { %v872_v14 = vadd.f32 %v871_v1, %v841_v61  ;;  %v3075_v61 = vld [vmem:[%s4156_s4 + $0x3] ss:$0 sm:$0xff] }
 0x2d6   :  { %4200 = vst [vmem:[#allocation25_spill] sm:$0xff] %v3075_v61  ;;  %v3079_v1 = vadd.f32 %v3075_v61, %v2588_v54  ;;  %v3099_v54 = vadd.f32 %v3075_v61, %v2598_v3  ;;  %v3119_v3 = vadd.f32 %v3075_v61, %v2608_v15  ;;  %v3139_v15 = vadd.f32 %v3075_v61, %v2624_v28 }
 0x2d7   :  { %v873_v45 = vadd.f32 %v872_v14, %v842_v29  ;;  %v3083_v29 = vadd.f32 %v3075_v61, %v2590_v57  ;;  %v3103_v57 = vadd.f32 %v3075_v61, %v2600_v5  ;;  %v3123_v5 = vadd.f32 %v3075_v61, %v2612_v18  ;;  %v4201_v14 = vld [vmem:[#allocation8_spill] sm:$0xff] }
 0x2d8   :  { %v3143_v18 = vadd.f32 %v3075_v61, %v2626_v30 }
 0x2d9   :  { %v874_v51 = vadd.f32 %v873_v45, %v843_v31  ;;  %v4202_v31 = vld [vmem:[#allocation9_spill] sm:$0xff] }
 0x2da   :  { %v3159_v28 = vadd.f32 %v3075_v61, %v4202_v31 }
 0x2db   :  { %v875_v19 = vadd.f32 %v874_v51, %v844_v9  ;;  %v4204_v9 = vld [vmem:[#allocation10_spill] sm:$0xff]  ;;  %v4206_v51 = vld [vmem:[#allocation11_spill] sm:$0xff] }
 0x2dc   :  { %4203 = vst [vmem:[#allocation8_spill] sm:$0xff] %v3159_v28  ;;  %v3163_v30 = vadd.f32 %v3075_v61, %v4204_v9  ;;  %v4216_v9 = vld [vmem:[#allocation16_spill] sm:$0xff]  ;;  %v4226_v28 = vld [vmem:[#allocation23_spill] sm:$0xff] }
 0x2dd   :  { %v876_v50 = vrot.slane %v875_v19, 4 }
 0x2de   :  { %4205 = vst [vmem:[#allocation9_spill] sm:$0xff] %v3163_v30  ;;  %v4225_v30 = vld [vmem:[#allocation22_spill] sm:$0xff] }
 0x2df   :  { %v877_v6 = vadd.f32 %v876_v50, %v875_v19  ;;  %v4208_v19 = vld [vmem:[#allocation12_spill] sm:$0xff]  ;;  %v4210_v50 = vld [vmem:[#allocation13_spill] sm:$0xff] }
 0x2e1   :  { %v878_v27 = vrot.slane %v877_v6, 2 }
 0x2e3   :  { %v879_v34 = vadd.f32 %v878_v27, %v877_v6  ;;  %v3087_v6 = vadd.f32 %v3075_v61, %v2592_v59  ;;  %v3107_v59 = vadd.f32 %v3075_v61, %v2602_v8  ;;  %v3127_v8 = vadd.f32 %v3075_v61, %v2614_v20 }
 0x2e4   :  { %v3147_v20 = vadd.f32 %v3075_v61, %v2628_v33  ;;  %v3167_v33 = vadd.f32 %v3075_v61, %v4206_v51  ;;  %v3175_v27 = vadd.f32 %v3075_v61, %v4210_v50  ;;  %v3192_v51 = vadd.f32 %v3075_v61, %v4216_v9  ;;  %v4218_v50 = vld [vmem:[#allocation17_spill] sm:$0xff] }
 0x2e5   :  { %v880_v46 = vrot.slane %v879_v34, 1 }
 0x2e6   :  { %4207 = vst [vmem:[#allocation10_spill] sm:$0xff] %v3167_v33  ;;  %4211 = vst [vmem:[#allocation12_spill] sm:$0xff] %v3175_v27  ;;  %v3197_v27 = vadd.f32 %v3075_v61, %v4218_v50 }
 0x2e7   :  { %v881_v43 = vadd.f32 %v880_v46, %v879_v34  ;;  %v3095_v46 = vadd.f32 %v3075_v61, %v2596_v0  ;;  %v3115_v0 = vadd.f32 %v3075_v61, %v2606_v13  ;;  %v3135_v13 = vadd.f32 %v3075_v61, %v2620_v25  ;;  %v3180_v34 = vld [vmem:[%s4156_s4 + $0x1] ss:$0 sm:$0xff] }
 0x2e8   :  { %v3155_v25 = vadd.f32 %v3075_v61, %v4201_v14  ;;  %v4214_v14 = vld [vmem:[#allocation15_spill] sm:$0xff]  ;;  %4219 = vst [vmem:[#allocation16_spill] sm:$0xff] %v3197_v27 }
 0x2e9   :  { %v882_v22 = vmul.f32 0.00390625, %v881_v43  ;;  %v3091_v43 = vadd.f32 %v3075_v61, %v2594_v62  ;;  %v3111_v62 = vadd.f32 %v3075_v61, %v2604_v10  ;;  %v3131_v10 = vadd.f32 %v3075_v61, %v2618_v23  ;;  %4217 = vst [vmem:[#allocation15_spill] sm:$0xff] %v3192_v51 }
 0x2ea   :  { %v3151_v23 = vadd.f32 %v3075_v61, %v2630_v35  ;;  %v3171_v35 = vadd.f32 %v3075_v61, %v4208_v19  ;;  %v3188_v31 = vadd.f32 %v3075_v61, %v4214_v14  ;;  %v3208_v14 = vld [vmem:[%s4156_s4 + $0x2] ss:$0 sm:$0xff] }
 0x2eb   :  { %v883_v60 = vadd.f32 1e-05, %v882_v22  ;;  %v4212_v22 = vld [vmem:[#allocation14_spill] sm:$0xff] }
 0x2ec   :  { %4209 = vst [vmem:[#allocation11_spill] sm:$0xff] %v3171_v35  ;;  %4215 = vst [vmem:[#allocation14_spill] sm:$0xff] %v3188_v31  ;;  %v4220_v35 = vld [vmem:[#allocation18_spill] sm:$0xff] }
 0x2ed   :  { %2322 = vrsqrt.f32 %v883_v60  ;;  %v3184_v60 = vadd.f32 %v3075_v61, %v4212_v22  ;;  %v3201_v33 = vadd.f32 %v3075_v61, %v4220_v35 }
 0x2ef   :  { %4213 = vst [vmem:[#allocation13_spill] sm:$0xff] %v3184_v60  ;;  %4221 = vst [vmem:[#allocation17_spill] sm:$0xff] %v3201_v33  ;;  %v4222_v33 = vld [vmem:[#allocation24_spill] sm:$0xff] }
 0x2f7   :  { %v2323_v45 = vpop.eup %2322 }
 0x2f8   :  { %v916_v19 = vmul.f32 %v2323_v45, %v2976_v12  ;;  %v885_v22 = vmul.f32 %v2323_v45, %v2979_v4  ;;  %v886_v60 = vmul.f32 %v2323_v45, %v2982_v7  ;;  %v887_v12 = vmul.f32 %v2323_v45, %v2985_v55 }
 0x2f9   :  { %v888_v50 = vmul.f32 %v2323_v45, %v2992_v11  ;;  %v889_v27 = vmul.f32 %v2323_v45, %v2995_v58  ;;  %v890_v35 = vmul.f32 %v2323_v45, %v3000_v44  ;;  %v891_v51 = vmul.f32 %v2323_v45, %v4222_v33 }
 0x2fa   :  { %v952_v9 = vmul.f32 %v3180_v34, %v916_v19  ;;  %v892_v4 = vmul.f32 %v2323_v45, %v3010_v37  ;;  %v893_v7 = vmul.f32 %v2323_v45, %v3015_v49  ;;  %v894_v31 = vmul.f32 %v2323_v45, %v3020_v17 }
 0x2fb   :  { %v895_v61 = vmul.f32 %v2323_v45, %v2913_v16  ;;  %v896_v19 = vmul.f32 %v2323_v45, %v2916_v38  ;;  %v897_v55 = vmul.f32 %v2323_v45, %v2919_v40  ;;  %v898_v58 = vmul.f32 %v2323_v45, %v2922_v48 }
 0x2fc   :  { %v3223_v11 = vadd.f32 %v3208_v14, %v952_v9  ;;  %v899_v44 = vmul.f32 %v2323_v45, %v2925_v24  ;;  %v905_v33 = vmul.f32 %v2323_v45, %v2946_v32  ;;  %v906_v37 = vmul.f32 %v2323_v45, %v2949_v41 }
 0x2fd   :  { %v907_v49 = vmul.f32 %v2323_v45, %v2952_v56  ;;  %v908_v17 = vmul.f32 %v2323_v45, %v2955_v53  ;;  %v909_v16 = vmul.f32 %v2323_v45, %v2958_v21  ;;  %v910_v38 = vmul.f32 %v2323_v45, %v2961_v63 }
 0x2fe   :  { %4223 = vst [vmem:[#allocation18_spill] sm:$0xff] %v3223_v11  ;;  %v911_v40 = vmul.f32 %v2323_v45, %v2964_v52  ;;  %v912_v9 = vmul.f32 %v2323_v45, %v2967_v42  ;;  %v913_v48 = vmul.f32 %v2323_v45, %v2970_v47  ;;  %v900_v24 = vmul.f32 %v2323_v45, %v2928_v2  ;;  %v4224_v11 = vld [vmem:[#allocation21_spill] sm:$0xff] }
 0x2ff   :  { %v901_v32 = vmul.f32 %v2323_v45, %v2934_v26  ;;  %v914_v41 = vmul.f32 %v2323_v45, %v2972_v36  ;;  %v915_v56 = vmul.f32 %v2323_v45, %v2974_v39  ;;  %v902_v53 = vmul.f32 %v2323_v45, %v4224_v11 }
 0x300   :  { %v903_v21 = vmul.f32 %v2323_v45, %v4225_v30  ;;  %v904_v63 = vmul.f32 %v2323_v45, %v4226_v28  ;;  %v921_v52 = vmul.f32 %v3180_v34, %v885_v22  ;;  %v922_v42 = vmul.f32 %v3180_v34, %v886_v60 }
 0x301   :  { %v923_v47 = vmul.f32 %v3180_v34, %v887_v12  ;;  %v924_v2 = vmul.f32 %v3180_v34, %v888_v50  ;;  %v925_v26 = vmul.f32 %v3180_v34, %v889_v27  ;;  %v926_v36 = vmul.f32 %v3180_v34, %v890_v35 }
 0x302   :  { %v927_v39 = vmul.f32 %v3180_v34, %v891_v51  ;;  %v928_v11 = vmul.f32 %v3180_v34, %v892_v4  ;;  %v929_v30 = vmul.f32 %v3180_v34, %v893_v7  ;;  %v930_v28 = vmul.f32 %v3180_v34, %v894_v31 }
 0x303   :  { %v931_v45 = vmul.f32 %v3180_v34, %v895_v61  ;;  %v932_v60 = vmul.f32 %v3180_v34, %v896_v19  ;;  %v933_v22 = vmul.f32 %v3180_v34, %v897_v55  ;;  %v934_v12 = vmul.f32 %v3180_v34, %v898_v58 }
 0x304   :  { %v935_v27 = vmul.f32 %v3180_v34, %v899_v44  ;;  %v936_v50 = vmul.f32 %v3180_v34, %v900_v24  ;;  %v937_v51 = vmul.f32 %v3180_v34, %v901_v32  ;;  %v938_v35 = vmul.f32 %v3180_v34, %v902_v53 }
 0x305   :  { %v939_v4 = vmul.f32 %v3180_v34, %v903_v21  ;;  %v940_v31 = vmul.f32 %v3180_v34, %v904_v63  ;;  %v941_v61 = vmul.f32 %v3180_v34, %v905_v33  ;;  %v942_v7 = vmul.f32 %v3180_v34, %v906_v37 }
 0x306   :  { %v943_v19 = vmul.f32 %v3180_v34, %v907_v49  ;;  %v944_v55 = vmul.f32 %v3180_v34, %v908_v17  ;;  %v945_v58 = vmul.f32 %v3180_v34, %v909_v16  ;;  %v946_v44 = vmul.f32 %v3180_v34, %v910_v38 }
 0x307   :  { %v947_v24 = vmul.f32 %v3180_v34, %v911_v40  ;;  %v3271_v32 = vmul.f32 %v3180_v34, %v912_v9  ;;  %v3274_v53 = vmul.f32 %v3180_v34, %v913_v48  ;;  %v3277_v33 = vmul.f32 %v3180_v34, %v914_v41 }
 0x308   :  { %v3280_v37 = vmul.f32 %v3180_v34, %v915_v56  ;;  %v957_v49 = vadd.f32 %v3208_v14, %v921_v52  ;;  %v958_v17 = vadd.f32 %v3208_v14, %v922_v42  ;;  %v959_v16 = vadd.f32 %v3208_v14, %v923_v47 }
 0x309   :  { %v960_v38 = vadd.f32 %v3208_v14, %v924_v2  ;;  %v961_v40 = vadd.f32 %v3208_v14, %v925_v26  ;;  %v962_v9 = vadd.f32 %v3208_v14, %v926_v36  ;;  %v963_v48 = vadd.f32 %v3208_v14, %v927_v39 }
 0x30a   :  { %v964_v41 = vadd.f32 %v3208_v14, %v928_v11  ;;  %v965_v21 = vadd.f32 %v3208_v14, %v929_v30  ;;  %v966_v34 = vadd.f32 %v3208_v14, %v930_v28  ;;  %v967_v56 = vadd.f32 %v3208_v14, %v931_v45 }
 0x30b   :  { %v968_v63 = vadd.f32 %v3208_v14, %v932_v60  ;;  %v969_v52 = vadd.f32 %v3208_v14, %v933_v22  ;;  %v970_v42 = vadd.f32 %v3208_v14, %v934_v12  ;;  %v3297_v47 = vadd.f32 %v3208_v14, %v935_v27 }
 0x30c   :  { %v3300_v2 = vadd.f32 %v3208_v14, %v936_v50  ;;  %v3303_v26 = vadd.f32 %v3208_v14, %v937_v51  ;;  %v3306_v36 = vadd.f32 %v3208_v14, %v938_v35  ;;  %v3309_v39 = vadd.f32 %v3208_v14, %v939_v4 }
 0x30d   :  { %v3312_v11 = vadd.f32 %v3208_v14, %v940_v31  ;;  %v3315_v30 = vadd.f32 %v3208_v14, %v941_v61  ;;  %v3318_v28 = vadd.f32 %v3208_v14, %v942_v7  ;;  %v3321_v45 = vadd.f32 %v3208_v14, %v943_v19 }
 0x30e   :  { %v3324_v60 = vadd.f32 %v3208_v14, %v944_v55  ;;  %v3327_v22 = vadd.f32 %v3208_v14, %v945_v58  ;;  %v3330_v12 = vadd.f32 %v3208_v14, %v946_v44  ;;  %v991_v27 = vmax.f32 %v959_v16, 0.0 }
 0x30f   :  { %v992_v50 = vmax.f32 %v960_v38, 0.0  ;;  %v989_v51 = vmax.f32 %v957_v49, 0.0  ;;  %v990_v35 = vmax.f32 %v958_v17, 0.0  ;;  %v993_v4 = vmax.f32 %v961_v40, 0.0 }
 0x310   :  { %v994_v31 = vmax.f32 %v962_v9, 0.0  ;;  %v995_v61 = vmax.f32 %v963_v48, 0.0  ;;  %v996_v7 = vmax.f32 %v964_v41, 0.0  ;;  %v3333_v19 = vadd.f32 %v991_v27, %v3087_v6 }
 0x311   :  { %v3336_v55 = vadd.f32 %v992_v50, %v3091_v43  ;;  %v3339_v58 = vadd.f32 %v989_v51, %v3079_v1  ;;  %v3342_v44 = vadd.f32 %v990_v35, %v3083_v29  ;;  %v3345_v16 = vadd.f32 %v993_v4, %v3095_v46  ;;  %v4242_v51 = vld [vmem:[#allocation19_spill] sm:$0xff]  ;;  %v4243_v35 = vld [vmem:[#allocation25_spill] sm:$0xff] }
 0x312   :  { %v3348_v49 = vadd.f32 %v994_v31, %v3099_v54  ;;  %v3351_v17 = vadd.f32 %v995_v61, %v3103_v57  ;;  %v3354_v6 = vadd.f32 %v996_v7, %v3107_v59  ;;  %1055 = vst [vmem:[#allocation2 + $0x10] sm:$0xff] %v3333_v19  ;;  %v997_v43 = vmax.f32 %v965_v21, 0.0 }
 0x313   :  { %1056 = vst [vmem:[#allocation2 + $0x18] sm:$0xff] %v3336_v55  ;;  %1053 = vst [vmem:[#allocation2] sm:$0xff] %v3339_v58  ;;  %v1085_v1 = vpack.c.bf16 %v3342_v44, %v3339_v58  ;;  %v1086_v29 = vpack.c.bf16 %v3336_v55, %v3333_v19  ;;  %v998_v46 = vmax.f32 %v966_v34, 0.0  ;;  %v3365_v54 = vadd.f32 %v3208_v14, %v947_v24 }
 0x314   :  { %1054 = vst [vmem:[#allocation2 + $0x8] sm:$0xff] %v3342_v44  ;;  %1057 = vst [vmem:[#allocation2 + $0x20] sm:$0xff] %v3345_v16  ;;  %v1087_v57 = vpack.c.bf16 %v3348_v49, %v3345_v16  ;;  %v999_v59 = vmax.f32 %v967_v56, 0.0  ;;  %v1000_v38 = vmax.f32 %v968_v63, 0.0  ;;  %v3374_v40 = vadd.f32 %v997_v43, %v3111_v62 }
 0x315   :  { %1058 = vst [vmem:[#allocation2 + $0x28] sm:$0xff] %v3348_v49  ;;  %1059 = vst [vmem:[#allocation2 + $0x30] sm:$0xff] %v3351_v17  ;;  %2210 = vmatprep.mubr.bf16.mxu0 %v1085_v1  ;;  %v3377_v24 = vadd.f32 %v998_v46, %v3115_v0  ;;  %v1001_v9 = vmax.f32 %v969_v52, 0.0  ;;  %v1002_v48 = vmax.f32 %v970_v42, 0.0  ;;  %v1003_v34 = vmax.f32 %v3297_v47, 0.0  ;;  %v4246_v1 = vld [vmem:[#allocation20_spill] sm:$0xff] }
 0x316   :  { %1060 = vst [vmem:[#allocation2 + $0x38] sm:$0xff] %v3354_v6  ;;  %2211 = vmatmul.mubr.bf16.vlgmr.msra.gmra.mrb[84].mxu0 %v1086_v29  ;;  %v3380_v41 = vadd.f32 %v999_v59, %v3119_v3  ;;  %v3383_v21 = vadd.f32 %v1000_v38, %v3123_v5  ;;  %v1004_v56 = vmax.f32 %v3300_v2, 0.0  ;;  %v984_v62 = vadd.f32 %v3208_v14, %v3271_v32  ;;  %v4249_v59 = vld [vmem:[#allocation14_spill] sm:$0xff] }
 0x317   :  { %2214 = vmatprep.mubr.bf16.mxu0 %v1087_v57  ;;  %1061 = vst [vmem:[#allocation2 + $0x40] sm:$0xff] %v3374_v40  ;;  %1062 = vst [vmem:[#allocation2 + $0x48] sm:$0xff] %v3377_v24  ;;  %v3392_v0 = vadd.f32 %v1001_v9, %v3127_v8  ;;  %v3395_v3 = vadd.f32 %v1002_v48, %v3131_v10  ;;  %v1005_v5 = vmax.f32 %v3303_v26, 0.0  ;;  %v1006_v8 = vmax.f32 %v3306_v36, 0.0  ;;  %v4234_v36 = vld [vmem:[#allocation8_spill] sm:$0xff] }
 0x318   :  { %v985_v63 = vadd.f32 %v3208_v14, %v3274_v53  ;;  %1063 = vst [vmem:[#allocation2 + $0x50] sm:$0xff] %v3380_v41  ;;  %1064 = vst [vmem:[#allocation2 + $0x58] sm:$0xff] %v3383_v21  ;;  %v3403_v32 = vadd.f32 %v1003_v34, %v3135_v13  ;;  %v3406_v52 = vadd.f32 %v1004_v56, %v3139_v15  ;;  %v1007_v42 = vmax.f32 %v3309_v39, 0.0  ;;  %v4253_v34 = vld [vmem:[#allocation18_spill] sm:$0xff] }
 0x319   :  { %4227 = vst [vmem:[#allocation24_spill] sm:$0xff] %v3395_v3  ;;  %v986_v10 = vadd.f32 %v3208_v14, %v3277_v33  ;;  %1065 = vst [vmem:[#allocation2 + $0x60] sm:$0xff] %v3392_v0  ;;  %v3414_v53 = vadd.f32 %v1005_v5, %v3143_v18  ;;  %v1008_v13 = vmax.f32 %v3312_v11, 0.0  ;;  %v987_v15 = vadd.f32 %v3208_v14, %v3280_v37  ;;  %v4236_v11 = vld [vmem:[#allocation9_spill] sm:$0xff] }
 0x31a   :  { %4228 = vst [vmem:[#allocation21_spill] sm:$0xff] %v3403_v32  ;;  %4229 = vst [vmem:[#allocation22_spill] sm:$0xff] %v3406_v52  ;;  %v3423_v33 = vadd.f32 %v1006_v8, %v3147_v20  ;;  %v1009_v47 = vmax.f32 %v3315_v30, 0.0  ;;  %v1010_v2 = vmax.f32 %v3318_v28, 0.0  ;;  %v3429_v18 = vadd.f32 %v1007_v42, %v3151_v23  ;;  %v4238_v28 = vld [vmem:[#allocation10_spill] sm:$0xff]  ;;  %v4256_v8 = vld [vmem:[#allocation17_spill] sm:$0xff] }
 0x31b   :  { %1066 = vst [vmem:[#allocation2 + $0x68] sm:$0xff] %v3395_v3  ;;  %4230 = vst [vmem:[#allocation23_spill] sm:$0xff] %v3414_v53  ;;  %v3432_v26 = vadd.f32 %v1008_v13, %v3155_v25  ;;  %v1011_v14 = vmax.f32 %v3321_v45, 0.0  ;;  %v1012_v37 = vmax.f32 %v3324_v60, 0.0  ;;  %v1088_v20 = vpack.c.bf16 %v3354_v6, %v3351_v17  ;;  %v4240_v60 = vld [vmem:[#allocation11_spill] sm:$0xff] }
 0x31c   :  { %1067 = vst [vmem:[#allocation2 + $0x70] sm:$0xff] %v3403_v32  ;;  %1068 = vst [vmem:[#allocation2 + $0x78] sm:$0xff] %v3406_v52  ;;  %v3440_v39 = vadd.f32 %v1009_v47, %v4234_v36  ;;  %v3443_v30 = vadd.f32 %v1010_v2, %v4236_v11  ;;  %v1013_v23 = vmax.f32 %v3327_v22, 0.0  ;;  %v1089_v25 = vpack.c.bf16 %v3377_v24, %v3374_v40  ;;  %v4244_v22 = vld [vmem:[#allocation12_spill] sm:$0xff] }
 0x31d   :  { %4231 = vst [vmem:[#allocation26_spill] sm:$0xff] %v3423_v33  ;;  %1069 = vst [vmem:[#allocation2 + $0x80] sm:$0xff] %v3414_v53  ;;  %v3451_v45 = vadd.f32 %v1011_v14, %v4238_v28  ;;  %v3454_v27 = vadd.f32 %v1012_v37, %v4240_v60  ;;  %v1014_v50 = vmax.f32 %v3330_v12, 0.0  ;;  %v400_v4 = vadd.f32 %v4243_v35, %v4242_v51  ;;  %v4247_v12 = vld [vmem:[#allocation13_spill] sm:$0xff] }
 0x31e   :  { %4232 = vst [vmem:[#allocation27_spill] sm:$0xff] %v3429_v18  ;;  %4233 = vst [vmem:[#allocation28_spill] sm:$0xff] %v3432_v26  ;;  %2215 = vmatmul.mubr.bf16.gmra.mrb[88].mxu0 %v1088_v20  ;;  %v3462_v31 = vadd.f32 %v1013_v23, %v4244_v22  ;;  %v1015_v61 = vmax.f32 %v3365_v54, 0.0  ;;  %v1016_v7 = vmax.f32 %v984_v62, 0.0  ;;  %v401_v29 = vadd.f32 %v4243_v35, %v4246_v1  ;;  %v4251_v54 = vld [vmem:[#allocation15_spill] sm:$0xff]  ;;  %v4254_v62 = vld [vmem:[#allocation16_spill] sm:$0xff] }
 0x31f   :  { %1070 = vst [vmem:[#allocation2 + $0x88] sm:$0xff] %v3423_v33  ;;  %4235 = vst [vmem:[#allocation8_spill] sm:$0xff] %v3440_v39  ;;  %2218 = vmatprep.mubr.bf16.mxu0 %v1089_v25  ;;  %v3470_v43 = vadd.f32 %v1014_v50, %v4247_v12  ;;  %v1017_v46 = vmax.f32 %v985_v63, 0.0  ;;  %v1018_v57 = vmax.f32 %v986_v10, 0.0  ;;  %v1019_v48 = vmax.f32 %v987_v15, 0.0 }
 0x320   :  { %4237 = vst [vmem:[#allocation9_spill] sm:$0xff] %v3443_v30  ;;  %1071 = vst [vmem:[#allocation2 + $0x90] sm:$0xff] %v3429_v18  ;;  %v3474_v38 = vadd.f32 %v1015_v61, %v4249_v59  ;;  %v3477_v9 = vadd.f32 %v1016_v7, %v4251_v54  ;;  %v1020_v56 = vmax.f32 %v4253_v34, 0.0  ;;  %v1090_v13 = vpack.c.bf16 %v3383_v21, %v3380_v41 }
 0x321   :  { %1072 = vst [vmem:[#allocation2 + $0x98] sm:$0xff] %v3432_v26  ;;  %4239 = vst [vmem:[#allocation10_spill] sm:$0xff] %v3451_v45  ;;  %v3482_v5 = vadd.f32 %v1017_v46, %v4254_v62  ;;  %v3485_v42 = vadd.f32 %v1018_v57, %v4256_v8  ;;  %v3489_v63 = vadd.f32 %v1019_v48, %v400_v4 }
 0x322   :  { %4241 = vst [vmem:[#allocation11_spill] sm:$0xff] %v3454_v27  ;;  %1073 = vst [vmem:[#allocation2 + $0xa0] sm:$0xff] %v3440_v39  ;;  %v3491_v10 = vadd.f32 %v1020_v56, %v401_v29  ;;  %v1091_v15 = vpack.c.bf16 %v3395_v3, %v3392_v0  ;;  %v1092_v47 = vpack.c.bf16 %v3406_v52, %v3403_v32 }
 0x323   :  { %1074 = vst [vmem:[#allocation2 + $0xa8] sm:$0xff] %v3443_v30  ;;  %4245 = vst [vmem:[#allocation19_spill] sm:$0xff] %v3462_v31  ;;  %v1093_v2 = vpack.c.bf16 %v3423_v33, %v3414_v53  ;;  %v1094_v14 = vpack.c.bf16 %v3432_v26, %v3429_v18  ;;  %v1095_v37 = vpack.c.bf16 %v3443_v30, %v3440_v39 }
 0x324   :  { %1075 = vst [vmem:[#allocation2 + $0xb0] sm:$0xff] %v3451_v45  ;;  %1076 = vst [vmem:[#allocation2 + $0xb8] sm:$0xff] %v3454_v27  ;;  %v1096_v20 = vpack.c.bf16 %v3454_v27, %v3451_v45  ;;  %v1097_v36 = vpack.c.bf16 %v3470_v43, %v3462_v31  ;;  %v1098_v11 = vpack.c.bf16 %v3477_v9, %v3474_v38 }
 0x325   :  { %4248 = vst [vmem:[#allocation25_spill] sm:$0xff] %v3470_v43  ;;  %1077 = vst [vmem:[#allocation2 + $0xc0] sm:$0xff] %v3462_v31  ;;  %v1099_v23 = vpack.c.bf16 %v3485_v42, %v3482_v5  ;;  %v1100_v25 = vpack.c.bf16 %v3491_v10, %v3489_v63 }
 0x326   :  { %4250 = vst [vmem:[#allocation12_spill] sm:$0xff] %v3474_v38  ;;  %4252 = vst [vmem:[#allocation20_spill] sm:$0xff] %v3477_v9  ;;  %2219 = vmatmul.mubr.bf16.gmra.mrb[92].mxu0 %v1090_v13 }
 0x327   :  { %1078 = vst [vmem:[#allocation2 + $0xc8] sm:$0xff] %v3470_v43  ;;  %4255 = vst [vmem:[#allocation13_spill] sm:$0xff] %v3482_v5  ;;  %2222 = vmatprep.mubr.bf16.mxu0 %v1091_v15 }
 0x328   :  { %4257 = vst [vmem:[#allocation14_spill] sm:$0xff] %v3485_v42  ;;  %1079 = vst [vmem:[#allocation2 + $0xd0] sm:$0xff] %v3474_v38 }
 0x329   :  { %1080 = vst [vmem:[#allocation2 + $0xd8] sm:$0xff] %v3477_v9  ;;  %4258 = vst [vmem:[#allocation15_spill] sm:$0xff] %v3489_v63 }
 0x32a   :  { %1081 = vst [vmem:[#allocation2 + $0xe0] sm:$0xff] %v3482_v5  ;;  %1082 = vst [vmem:[#allocation2 + $0xe8] sm:$0xff] %v3485_v42 }
 0x32b   :  { %1083 = vst [vmem:[#allocation2 + $0xf0] sm:$0xff] %v3489_v63  ;;  %1084 = vst [vmem:[#allocation2 + $0xf8] sm:$0xff] %v3491_v10 }
 0x32e   :  { %2223 = vmatmul.mubr.bf16.gmra.mrb[96].mxu0 %v1092_v47 }
 0x32f   :  { %2226 = vmatprep.mubr.bf16.mxu0 %v1093_v2 }
 0x336   :  { %2227 = vmatmul.mubr.bf16.gmra.mrb[100].mxu0 %v1094_v14 }
 0x337   :  { %2230 = vmatprep.mubr.bf16.mxu0 %v1095_v37 }
 0x33e   :  { %2231 = vmatmul.mubr.bf16.gmra.mrb[104].mxu0 %v1096_v20 }
 0x33f   :  { %2234 = vmatprep.mubr.bf16.mxu0 %v1097_v36 }
 0x346   :  { %2235 = vmatmul.mubr.bf16.gmra.mrb[108].mxu0 %v1098_v11 }
 0x347   :  { %2238 = vmatprep.mubr.bf16.mxu0 %v1099_v23 }
 0x34e   :  { %2239 = vmatmul.mubr.bf16.gmra.mrb[112].mxu0 %v1100_v25 }
 0x3e9   :  { %v2212_v28 = vpop.f32.mrb[84].mxu0 }
 0x3ea   :  { %v1199_v60 = vpop.f32.mrb[85].mxu0 }
 0x3eb   :  { %v2213_v50 = vpop.f32.mrb[86].mxu0 }
 0x3ec   :  { %v1327_v51 = vpack.c.bf16 %v2213_v50, %v2212_v28  ;;  %v1202_v35 = vpop.f32.mrb[87].mxu0 }
 0x3ed   :  { %v1326_v4 = vpack.c.bf16 %v1202_v35, %v1199_v60 }
 0x3f1   :  { %v2216_v22 = vpop.f32.mrb[88].mxu0 }
 0x3f2   :  { %v1215_v61 = vpop.f32.mrb[89].mxu0 }
 0x3f3   :  { %v2217_v7 = vpop.f32.mrb[90].mxu0 }
 0x3f4   :  { %v1329_v1 = vpack.c.bf16 %v2217_v7, %v2216_v22  ;;  %v1218_v29 = vpop.f32.mrb[91].mxu0 }
 0x3f5   :  { %v1328_v12 = vpack.c.bf16 %v1218_v29, %v1215_v61 }
 0x3f9   :  { %v2220_v46 = vpop.f32.mrb[92].mxu0 }
 0x3fa   :  { %v1231_v57 = vpop.f32.mrb[93].mxu0 }
 0x3fb   :  { %v2221_v59 = vpop.f32.mrb[94].mxu0 }
 0x3fc   :  { %v1331_v54 = vpack.c.bf16 %v2221_v59, %v2220_v46  ;;  %v1234_v48 = vpop.f32.mrb[95].mxu0 }
 0x3fd   :  { %v1330_v34 = vpack.c.bf16 %v1234_v48, %v1231_v57 }
 0x401   :  { %v2224_v56 = vpop.f32.mrb[96].mxu0 }
 0x402   :  { %v1247_v62 = vpop.f32.mrb[97].mxu0 }
 0x403   :  { %v2225_v8 = vpop.f32.mrb[98].mxu0 }
 0x404   :  { %v1333_v13 = vpack.c.bf16 %v2225_v8, %v2224_v56  ;;  %v1250_v15 = vpop.f32.mrb[99].mxu0  ;;  %v2330_v8 = vld [vmem:[%s4153_s1 + $0x20] ss:$8 sps:$4 sm:$0xff]  }
 0x405   :  { %v1332_v47 = vpack.c.bf16 %v1250_v15, %v1247_v62  ;;  %v2332_v15 = vld [vmem:[%s4153_s1 + $0x30] ss:$8 sps:$4 sm:$0xff]  }
 0x409   :  { %v2228_v2 = vpop.f32.mrb[100].mxu0 }
 0x40a   :  { %v1263_v14 = vpop.f32.mrb[101].mxu0 }
 0x40b   :  { %v2229_v37 = vpop.f32.mrb[102].mxu0 }
 0x40c   :  { %v1335_v20 = vpack.c.bf16 %v2229_v37, %v2228_v2  ;;  %v1266_v36 = vpop.f32.mrb[103].mxu0  ;;  %v2334_v2 = vld [vmem:[%s4153_s1 + $0x40] ss:$8 sps:$4 sm:$0xff]   ;;  %v2336_v37 = vld [vmem:[%s4153_s1 + $0x50] ss:$8 sps:$4 sm:$0xff]  }
 0x40d   :  { %v1334_v11 = vpack.c.bf16 %v1266_v36, %v1263_v14  ;;  %v2335_v14 = vld [vmem:[%s4153_s1 + $0x54] ss:$8 sps:$4 sm:$0xff]   ;;  %v2338_v36 = vld [vmem:[%s4153_s1 + $0x60] ss:$8 sps:$4 sm:$0xff]  }
 0x40f   :  { %2082 = vmatprep.subr.bf16.mxu1 %v1334_v11  ;;  %v2339_v11 = vld [vmem:[%s4153_s1 + $0x74] ss:$8 sps:$4 sm:$0xff]  }
 0x410   :  { %2083 = vmatpush3.bf16.msra.mxu1 %v1326_v4 }
 0x411   :  { %v2232_v23 = vpop.f32.mrb[104].mxu0  ;;  %2084 = vmatprep.subr.bf16.mxu1 %v1335_v20  ;;  %v2337_v20 = vld [vmem:[%s4153_s1 + $0x64] ss:$8 sps:$4 sm:$0xff]  }
 0x412   :  { %v1279_v25 = vpop.f32.mrb[105].mxu0 }
 0x413   :  { %v2233_v28 = vpop.f32.mrb[106].mxu0 }
 0x414   :  { %v1337_v60 = vpack.c.bf16 %v2233_v28, %v2232_v23  ;;  %v1282_v50 = vpop.f32.mrb[107].mxu0  ;;  %2085 = vmatpush3.bf16.msra.mxu1 %v1327_v51  ;;  %v2340_v23 = vld [vmem:[%s4153_s1 + $0x70] ss:$8 sps:$4 sm:$0xff]   ;;  %v2342_v28 = vld [vmem:[%s4153_s1 + $0x80] ss:$8 sps:$4 sm:$0xff]  }
 0x415   :  { %v1336_v35 = vpack.c.bf16 %v1282_v50, %v1279_v25  ;;  %v2341_v25 = vld [vmem:[%s4153_s1 + $0x84] ss:$8 sps:$4 sm:$0xff]   ;;  %v2344_v50 = vld [vmem:[%s4153_s1 + $0x90] ss:$8 sps:$4 sm:$0xff]  }
 0x417   :  { %2086 = vmatprep.subr.bf16.mxu1 %v1336_v35  ;;  %v2345_v35 = vld [vmem:[%s4153_s1 + $0xa4] ss:$8 sps:$4 sm:$0xff]  }
 0x418   :  { %2087 = vmatpush3.bf16.msra.mxu1 %v1328_v12  ;;  %v2326_v12 = vld [vmem:[%s4153_s1] ss:$8 sps:$4 sm:$0xff]  }
 0x419   :  { %v2236_v22 = vpop.f32.mrb[108].mxu0  ;;  %2088 = vmatprep.subr.bf16.mxu1 %v1337_v60  ;;  %v2343_v60 = vld [vmem:[%s4153_s1 + $0x94] ss:$8 sps:$4 sm:$0xff]  }
 0x41a   :  { %v1295_v61 = vpop.f32.mrb[109].mxu0 }
 0x41b   :  { %v2237_v7 = vpop.f32.mrb[110].mxu0 }
 0x41c   :  { %v1339_v29 = vpack.c.bf16 %v2237_v7, %v2236_v22  ;;  %v1298_v46 = vpop.f32.mrb[111].mxu0  ;;  %2089 = vmatpush3.bf16.msra.mxu1 %v1329_v1  ;;  %v2327_v1 = vld [vmem:[%s4153_s1 + $0x14] ss:$8 sps:$4 sm:$0xff]   ;;  %v2346_v22 = vld [vmem:[%s4153_s1 + $0xa0] ss:$8 sps:$4 sm:$0xff]  }
 0x41d   :  { %v1338_v57 = vpack.c.bf16 %v1298_v46, %v1295_v61  ;;  %v2347_v61 = vld [vmem:[%s4153_s1 + $0xb4] ss:$8 sps:$4 sm:$0xff]   ;;  %v2348_v7 = vld [vmem:[%s4153_s1 + $0xb0] ss:$8 sps:$4 sm:$0xff]   ;;  %v2350_v46 = vld [vmem:[%s4153_s1 + $0xc0] ss:$8 sps:$4 sm:$0xff]  }
 0x41f   :  { %2090 = vmatprep.subr.bf16.mxu1 %v1338_v57  ;;  %v2351_v57 = vld [vmem:[%s4153_s1 + $0xd4] ss:$8 sps:$4 sm:$0xff]  }
 0x420   :  { %2091 = vmatpush3.bf16.msra.mxu1 %v1330_v34  ;;  %v2328_v34 = vld [vmem:[%s4153_s1 + $0x10] ss:$8 sps:$4 sm:$0xff]  }
 0x421   :  { %v2240_v4 = vpop.f32.mrb[112].mxu0  ;;  %2092 = vmatprep.subr.bf16.mxu1 %v1339_v29  ;;  %v2349_v29 = vld [vmem:[%s4153_s1 + $0xc4] ss:$8 sps:$4 sm:$0xff]  }
 0x422   :  { %v1311_v59 = vpop.f32.mrb[113].mxu0 }
 0x423   :  { %v2241_v48 = vpop.f32.mrb[114].mxu0 }
 0x424   :  { %v1341_v56 = vpack.c.bf16 %v2241_v48, %v2240_v4  ;;  %v1314_v62 = vpop.f32.mrb[115].mxu0  ;;  %2093 = vmatpush3.bf16.msra.mxu1 %v1331_v54  ;;  %v2329_v54 = vld [vmem:[%s4153_s1 + $0x24] ss:$8 sps:$4 sm:$0xff]   ;;  %v2352_v4 = vld [vmem:[%s4153_s1 + $0xd0] ss:$8 sps:$4 sm:$0xff]  }
 0x425   :  { %v1340_v51 = vpack.c.bf16 %v1314_v62, %v1311_v59  ;;  %v2353_v59 = vld [vmem:[%s4153_s1 + $0xe4] ss:$8 sps:$4 sm:$0xff]   ;;  %v2354_v48 = vld [vmem:[%s4153_s1 + $0xe0] ss:$8 sps:$4 sm:$0xff]   ;;  %v2356_v62 = vld [vmem:[%s4153_s1 + $0xf0] ss:$8 sps:$4 sm:$0xff]  }
 0x427   :  { %2094 = vmatprep.subr.bf16.mxu1 %v1340_v51 }
 0x428   :  { %2095 = vmatpush3.bf16.msra.mxu1 %v1332_v47  ;;  %v2333_v47 = vld [vmem:[%s4153_s1 + $0x44] ss:$8 sps:$4 sm:$0xff]  }
 0x429   :  { %2096 = vmatprep.subr.bf16.mxu1 %v1341_v56  ;;  %v2355_v56 = vld [vmem:[%s4153_s1 + $0xf4] ss:$8 sps:$4 sm:$0xff]  }
 0x42c   :  { %2097 = vmatpush3.bf16.msra.mxu1 %v1333_v13  ;;  %v2331_v13 = vld [vmem:[%s4153_s1 + $0x34] ss:$8 sps:$4 sm:$0xff]  }
 0x42f   :  { %1379 = vmatmul.mubr.bf16.vlgmr.msra.gmra.mrb[44].mxu1 %v2326_v12 }
 0x430   :  { %1386 = vmatprep.mubr.bf16.mxu1 %v2327_v1 }
 0x437   :  { %1387 = vmatmul.mubr.bf16.gmra.mrb[48].mxu1 %v2328_v34 }
 0x438   :  { %1394 = vmatprep.mubr.bf16.mxu1 %v2329_v54 }
 0x43f   :  { %1395 = vmatmul.mubr.bf16.gmra.mrb[52].mxu1 %v2330_v8 }
 0x440   :  { %1402 = vmatprep.mubr.bf16.mxu1 %v2331_v13 }
 0x447   :  { %1403 = vmatmul.mubr.bf16.gmra.mrb[56].mxu1 %v2332_v15 }
 0x448   :  { %1410 = vmatprep.mubr.bf16.mxu1 %v2333_v47 }
 0x44f   :  { %1411 = vmatmul.mubr.bf16.gmra.mrb[60].mxu1 %v2334_v2 }
 0x450   :  { %1418 = vmatprep.mubr.bf16.mxu1 %v2335_v14 }
 0x457   :  { %1419 = vmatmul.mubr.bf16.gmra.mrb[64].mxu1 %v2336_v37 }
 0x458   :  { %1426 = vmatprep.mubr.bf16.mxu1 %v2337_v20 }
 0x45f   :  { %1427 = vmatmul.mubr.bf16.gmra.mrb[68].mxu1 %v2338_v36 }
 0x460   :  { %1434 = vmatprep.mubr.bf16.mxu1 %v2339_v11 }
 0x467   :  { %1435 = vmatmul.mubr.bf16.gmra.mrb[72].mxu1 %v2340_v23 }
 0x468   :  { %1442 = vmatprep.mubr.bf16.mxu1 %v2341_v25 }
 0x46f   :  { %1443 = vmatmul.mubr.bf16.gmra.mrb[76].mxu1 %v2342_v28 }
 0x470   :  { %1450 = vmatprep.mubr.bf16.mxu1 %v2343_v60 }
 0x477   :  { %1451 = vmatmul.mubr.bf16.gmra.mrb[80].mxu1 %v2344_v50  ;;  %v3615_v50 = vld [vmem:[%s4156_s4 + $0x4] ss:$0 sm:$0xff] }
 0x478   :  { %1458 = vmatprep.mubr.bf16.mxu1 %v2345_v35 }
 0x47f   :  { %1459 = vmatmul.mubr.bf16.gmra.mrb[84].mxu1 %v2346_v22 }
 0x480   :  { %1466 = vmatprep.mubr.bf16.mxu1 %v2347_v61 }
 0x487   :  { %1467 = vmatmul.mubr.bf16.gmra.mrb[88].mxu1 %v2348_v7 }
 0x488   :  { %1474 = vmatprep.mubr.bf16.mxu1 %v2349_v29 }
 0x48f   :  { %1475 = vmatmul.mubr.bf16.gmra.mrb[92].mxu1 %v2350_v46 }
 0x490   :  { %1482 = vmatprep.mubr.bf16.mxu1 %v2351_v57 }
 0x497   :  { %1483 = vmatmul.mubr.bf16.gmra.mrb[96].mxu1 %v2352_v4 }
 0x498   :  { %1490 = vmatprep.mubr.bf16.mxu1 %v2353_v59 }
 0x49f   :  { %1491 = vmatmul.mubr.bf16.gmra.mrb[100].mxu1 %v2354_v48 }
 0x4a0   :  { %1498 = vmatprep.mubr.bf16.mxu1 %v2355_v56 }
 0x4a7   :  { %1499 = vmatmul.mubr.bf16.gmra.mrb[104].mxu1 %v2356_v62 }
 0x502   :  { %v2098_v51 = vpop.f32.mrb[44].mxu1 }
 0x503   :  { %v2099_v12 = vpop.f32.mrb[45].mxu1 }
 0x504   :  { %v2100_v1 = vadd.f32 %v2099_v12, %v2098_v51  ;;  %v2101_v34 = vpop.f32.mrb[46].mxu1 }
 0x505   :  { %v2102_v54 = vpop.f32.mrb[47].mxu1 }
 0x506   :  { %v2103_v8 = vadd.f32 %v2102_v54, %v2101_v34  ;;  %v3621_v46 = vadd.f32 %v2100_v1, %v3615_v50 }
 0x508   :  { %v3618_v22 = vadd.f32 %v2103_v8, %v3615_v50 }
 0x50a   :  { %v2104_v13 = vpop.f32.mrb[48].mxu1  ;;  %v1507_v59 = vadd.f32 %v3618_v22, %v3621_v46 }
 0x50b   :  { %v2105_v15 = vpop.f32.mrb[49].mxu1 }
 0x50c   :  { %v2106_v47 = vadd.f32 %v2105_v15, %v2104_v13  ;;  %v2107_v2 = vpop.f32.mrb[50].mxu1 }
 0x50d   :  { %v2108_v14 = vpop.f32.mrb[51].mxu1 }
 0x50e   :  { %v2109_v37 = vadd.f32 %v2108_v14, %v2107_v2  ;;  %v3624_v57 = vadd.f32 %v2106_v47, %v3615_v50 }
 0x510   :  { %v1508_v48 = vadd.f32 %v1507_v59, %v3624_v57  ;;  %v3630_v56 = vadd.f32 %v2109_v37, %v3615_v50 }
 0x512   :  { %v2110_v20 = vpop.f32.mrb[52].mxu1  ;;  %v1509_v8 = vadd.f32 %v1508_v48, %v3630_v56 }
 0x513   :  { %v2111_v36 = vpop.f32.mrb[53].mxu1 }
 0x514   :  { %v2112_v11 = vadd.f32 %v2111_v36, %v2110_v20  ;;  %v2113_v23 = vpop.f32.mrb[54].mxu1 }
 0x515   :  { %v2114_v25 = vpop.f32.mrb[55].mxu1 }
 0x516   :  { %v2115_v28 = vadd.f32 %v2114_v25, %v2113_v23  ;;  %v3633_v12 = vadd.f32 %v2112_v11, %v3615_v50 }
 0x518   :  { %v1510_v15 = vadd.f32 %v1509_v8, %v3633_v12  ;;  %v3638_v47 = vadd.f32 %v2115_v28, %v3615_v50 }
 0x51a   :  { %v2116_v60 = vpop.f32.mrb[56].mxu1  ;;  %v1511_v20 = vadd.f32 %v1510_v15, %v3638_v47 }
 0x51b   :  { %v2117_v35 = vpop.f32.mrb[57].mxu1 }
 0x51c   :  { %v2118_v61 = vadd.f32 %v2117_v35, %v2116_v60  ;;  %v2119_v7 = vpop.f32.mrb[58].mxu1 }
 0x51d   :  { %v2120_v29 = vpop.f32.mrb[59].mxu1 }
 0x51e   :  { %v2121_v4 = vadd.f32 %v2120_v29, %v2119_v7  ;;  %v3641_v2 = vadd.f32 %v2118_v61, %v3615_v50 }
 0x520   :  { %v1512_v25 = vadd.f32 %v1511_v20, %v3641_v2  ;;  %v3646_v60 = vadd.f32 %v2121_v4, %v3615_v50 }
 0x522   :  { %v2122_v62 = vpop.f32.mrb[60].mxu1  ;;  %v1513_v28 = vadd.f32 %v1512_v25, %v3646_v60 }
 0x523   :  { %v2123_v51 = vpop.f32.mrb[61].mxu1 }
 0x524   :  { %v2124_v34 = vadd.f32 %v2123_v51, %v2122_v62  ;;  %v2125_v1 = vpop.f32.mrb[62].mxu1 }
 0x525   :  { %v2126_v54 = vpop.f32.mrb[63].mxu1 }
 0x526   :  { %v2127_v13 = vadd.f32 %v2126_v54, %v2125_v1  ;;  %v3649_v7 = vadd.f32 %v2124_v34, %v3615_v50 }
 0x528   :  { %v1514_v59 = vadd.f32 %v1513_v28, %v3649_v7  ;;  %v3654_v48 = vadd.f32 %v2127_v13, %v3615_v50 }
 0x52a   :  { %v2128_v14 = vpop.f32.mrb[64].mxu1  ;;  %v1515_v8 = vadd.f32 %v1514_v59, %v3654_v48 }
 0x52b   :  { %v2129_v37 = vpop.f32.mrb[65].mxu1 }
 0x52c   :  { %v2130_v36 = vadd.f32 %v2129_v37, %v2128_v14  ;;  %v2131_v11 = vpop.f32.mrb[66].mxu1 }
 0x52d   :  { %v2132_v23 = vpop.f32.mrb[67].mxu1 }
 0x52e   :  { %v2133_v35 = vadd.f32 %v2132_v23, %v2131_v11  ;;  %v3657_v54 = vadd.f32 %v2130_v36, %v3615_v50 }
 0x530   :  { %v1516_v34 = vadd.f32 %v1515_v8, %v3657_v54  ;;  %v3662_v15 = vadd.f32 %v2133_v35, %v3615_v50 }
 0x532   :  { %v2134_v61 = vpop.f32.mrb[68].mxu1  ;;  %v1517_v25 = vadd.f32 %v1516_v34, %v3662_v15 }
 0x533   :  { %v2135_v29 = vpop.f32.mrb[69].mxu1 }
 0x534   :  { %v2136_v62 = vadd.f32 %v2135_v29, %v2134_v61  ;;  %v2137_v51 = vpop.f32.mrb[70].mxu1 }
 0x535   :  { %v2138_v1 = vpop.f32.mrb[71].mxu1 }
 0x536   :  { %v2139_v4 = vadd.f32 %v2138_v1, %v2137_v51  ;;  %v3665_v20 = vadd.f32 %v2136_v62, %v3615_v50 }
 0x538   :  { %v1518_v28 = vadd.f32 %v1517_v25, %v3665_v20  ;;  %v3670_v61 = vadd.f32 %v2139_v4, %v3615_v50 }
 0x53a   :  { %v2140_v14 = vpop.f32.mrb[72].mxu1  ;;  %v1519_v51 = vadd.f32 %v1518_v28, %v3670_v61 }
 0x53b   :  { %v2141_v37 = vpop.f32.mrb[73].mxu1 }
 0x53c   :  { %v2142_v13 = vadd.f32 %v2141_v37, %v2140_v14  ;;  %v2143_v11 = vpop.f32.mrb[74].mxu1 }
 0x53d   :  { %v2144_v23 = vpop.f32.mrb[75].mxu1 }
 0x53e   :  { %v2145_v36 = vadd.f32 %v2144_v23, %v2143_v11  ;;  %v3673_v29 = vadd.f32 %v2142_v13, %v3615_v50 }
 0x540   :  { %v1520_v14 = vadd.f32 %v1519_v51, %v3673_v29  ;;  %v3678_v34 = vadd.f32 %v2145_v36, %v3615_v50 }
 0x542   :  { %v2146_v35 = vpop.f32.mrb[76].mxu1  ;;  %v1521_v4 = vadd.f32 %v1520_v14, %v3678_v34 }
 0x543   :  { %v2147_v59 = vpop.f32.mrb[77].mxu1 }
 0x544   :  { %v2148_v62 = vadd.f32 %v2147_v59, %v2146_v35  ;;  %v2149_v1 = vpop.f32.mrb[78].mxu1 }
 0x545   :  { %v2150_v8 = vpop.f32.mrb[79].mxu1 }
 0x546   :  { %v2151_v37 = vadd.f32 %v2150_v8, %v2149_v1  ;;  %v3681_v11 = vadd.f32 %v2148_v62, %v3615_v50 }
 0x548   :  { %v1522_v25 = vadd.f32 %v1521_v4, %v3681_v11  ;;  %v3686_v28 = vadd.f32 %v2151_v37, %v3615_v50 }
 0x54a   :  { %v2152_v13 = vpop.f32.mrb[80].mxu1  ;;  %v1523_v1 = vadd.f32 %v1522_v25, %v3686_v28 }
 0x54b   :  { %v2153_v23 = vpop.f32.mrb[81].mxu1 }
 0x54c   :  { %v2154_v35 = vadd.f32 %v2153_v23, %v2152_v13  ;;  %v2155_v59 = vpop.f32.mrb[82].mxu1 }
 0x54d   :  { %v2156_v63 = vpop.f32.mrb[83].mxu1 }
 0x54e   :  { %v3689_v51 = vadd.f32 %v2154_v35, %v3615_v50  ;;  %v2157_v36 = vadd.f32 %v2156_v63, %v2155_v59 }
 0x550   :  { %v1524_v62 = vadd.f32 %v1523_v1, %v3689_v51  ;;  %v3694_v8 = vadd.f32 %v2157_v36, %v3615_v50 }
 0x552   :  { %v2158_v14 = vpop.f32.mrb[84].mxu1  ;;  %v1525_v13 = vadd.f32 %v1524_v62, %v3694_v8 }
 0x553   :  { %v2159_v42 = vpop.f32.mrb[85].mxu1 }
 0x554   :  { %v2160_v4 = vadd.f32 %v2159_v42, %v2158_v14  ;;  %v2161_v5 = vpop.f32.mrb[86].mxu1 }
 0x555   :  { %v2162_v37 = vpop.f32.mrb[87].mxu1 }
 0x556   :  { %v1461_v23 = vadd.f32 %v2160_v4, %v3615_v50  ;;  %v2163_v9 = vadd.f32 %v2162_v37, %v2161_v5 }
 0x558   :  { %v1526_v35 = vadd.f32 %v1525_v13, %v1461_v23  ;;  %v1464_v63 = vadd.f32 %v2163_v9, %v3615_v50 }
 0x55a   :  { %v1527_v59 = vadd.f32 %v1526_v35, %v1464_v63  ;;  %v2164_v25 = vpop.f32.mrb[88].mxu1 }
 0x55b   :  { %v2165_v38 = vpop.f32.mrb[89].mxu1 }
 0x55c   :  { %v2166_v1 = vadd.f32 %v2165_v38, %v2164_v25  ;;  %v2167_v43 = vpop.f32.mrb[90].mxu1 }
 0x55d   :  { %v2168_v36 = vpop.f32.mrb[91].mxu1 }
 0x55e   :  { %v1469_v31 = vadd.f32 %v2166_v1, %v3615_v50  ;;  %v2169_v27 = vadd.f32 %v2168_v36, %v2167_v43 }
 0x560   :  { %v1528_v42 = vadd.f32 %v1527_v59, %v1469_v31  ;;  %v1472_v14 = vadd.f32 %v2169_v27, %v3615_v50 }
 0x562   :  { %v1529_v45 = vadd.f32 %v1528_v42, %v1472_v14  ;;  %v2170_v62 = vpop.f32.mrb[92].mxu1 }
 0x563   :  { %v2171_v30 = vpop.f32.mrb[93].mxu1 }
 0x564   :  { %v2172_v4 = vadd.f32 %v2171_v30, %v2170_v62  ;;  %v2173_v5 = vpop.f32.mrb[94].mxu1 }
 0x565   :  { %v2174_v37 = vpop.f32.mrb[95].mxu1 }
 0x566   :  { %v1477_v9 = vadd.f32 %v2172_v4, %v3615_v50  ;;  %v2175_v13 = vadd.f32 %v2174_v37, %v2173_v5 }
 0x568   :  { %v1530_v35 = vadd.f32 %v1529_v45, %v1477_v9  ;;  %v1480_v38 = vadd.f32 %v2175_v13, %v3615_v50 }
 0x56a   :  { %v1531_v25 = vadd.f32 %v1530_v35, %v1480_v38  ;;  %v2176_v39 = vpop.f32.mrb[96].mxu1 }
 0x56b   :  { %v2177_v26 = vpop.f32.mrb[97].mxu1 }
 0x56c   :  { %v2178_v1 = vadd.f32 %v2177_v26, %v2176_v39  ;;  %v2179_v43 = vpop.f32.mrb[98].mxu1 }
 0x56d   :  { %v2180_v59 = vpop.f32.mrb[99].mxu1 }
 0x56e   :  { %v1485_v27 = vadd.f32 %v2178_v1, %v3615_v50  ;;  %v2181_v36 = vadd.f32 %v2180_v59, %v2179_v43 }
 0x570   :  { %v1532_v42 = vadd.f32 %v1531_v25, %v1485_v27  ;;  %v1488_v30 = vadd.f32 %v2181_v36, %v3615_v50 }
 0x572   :  { %v1533_v62 = vadd.f32 %v1532_v42, %v1488_v30  ;;  %v2182_v18 = vpop.f32.mrb[100].mxu1 }
 0x573   :  { %v2183_v33 = vpop.f32.mrb[101].mxu1 }
 0x574   :  { %v2184_v4 = vadd.f32 %v2183_v33, %v2182_v18  ;;  %v2185_v5 = vpop.f32.mrb[102].mxu1 }
 0x575   :  { %v2186_v45 = vpop.f32.mrb[103].mxu1 }
 0x576   :  { %v1493_v37 = vadd.f32 %v2184_v4, %v3615_v50  ;;  %v2187_v13 = vadd.f32 %v2186_v45, %v2185_v5 }
 0x578   :  { %v1534_v35 = vadd.f32 %v1533_v62, %v1493_v37  ;;  %v1496_v26 = vadd.f32 %v2187_v13, %v3615_v50 }
 0x57a   :  { %v1535_v39 = vadd.f32 %v1534_v35, %v1496_v26  ;;  %v2188_v53 = vpop.f32.mrb[104].mxu1 }
 0x57b   :  { %v2189_v52 = vpop.f32.mrb[105].mxu1 }
 0x57c   :  { %v2190_v1 = vadd.f32 %v2189_v52, %v2188_v53  ;;  %v2191_v43 = vpop.f32.mrb[106].mxu1 }
 0x57d   :  { %v2192_v25 = vpop.f32.mrb[107].mxu1 }
 0x57e   :  { %v1501_v59 = vadd.f32 %v2190_v1, %v3615_v50  ;;  %v2193_v36 = vadd.f32 %v2192_v25, %v2191_v43 }
 0x580   :  { %v1536_v42 = vadd.f32 %v1535_v39, %v1501_v59  ;;  %v1504_v33 = vadd.f32 %v2193_v36, %v3615_v50 }
 0x582   :  { %v1537_v18 = vadd.f32 %v1536_v42, %v1504_v33 }
 0x584   :  { %v1538_v32 = vrot.slane %v1537_v18, 4 }
 0x586   :  { %v1539_v3 = vadd.f32 %v1538_v32, %v1537_v18 }
 0x588   :  { %v1540_v4 = vrot.slane %v1539_v3, 2 }
 0x58a   :  { %v1541_v5 = vadd.f32 %v1540_v4, %v1539_v3 }
 0x58c   :  { %v1542_v62 = vrot.slane %v1541_v5, 1 }
 0x58e   :  { %v1543_v45 = vadd.f32 %v1542_v62, %v1541_v5 }
 0x590   :  { %v3709_v13 = vmul.f32 0.00390625, %v1543_v45 }
 0x592   :  { %v3712_v35 = vsub.f32 %v1461_v23, %v3709_v13  ;;  %v3715_v52 = vsub.f32 %v1464_v63, %v3709_v13  ;;  %v3718_v53 = vsub.f32 %v1469_v31, %v3709_v13  ;;  %v3721_v50 = vsub.f32 %v1472_v14, %v3709_v13 }
 0x593   :  { %v3724_v32 = vsub.f32 %v1477_v9, %v3709_v13  ;;  %v3727_v3 = vsub.f32 %v1480_v38, %v3709_v13  ;;  %v3730_v39 = vsub.f32 %v1485_v27, %v3709_v13  ;;  %v3733_v23 = vsub.f32 %v1488_v30, %v3709_v13 }
 0x594   :  { %v3736_v63 = vsub.f32 %v1493_v37, %v3709_v13  ;;  %v3739_v31 = vsub.f32 %v1496_v26, %v3709_v13  ;;  %v3742_v14 = vsub.f32 %v1501_v59, %v3709_v13  ;;  %v3745_v9 = vsub.f32 %v1504_v33, %v3709_v13 }
 0x595   :  { %v3749_v38 = vsub.f32 %v3621_v46, %v3709_v13  ;;  %v3753_v27 = vsub.f32 %v3618_v22, %v3709_v13  ;;  %v3757_v30 = vsub.f32 %v3624_v57, %v3709_v13  ;;  %v3765_v1 = vsub.f32 %v3630_v56, %v3709_v13 }
 0x596   :  { %v3769_v46 = vsub.f32 %v3633_v12, %v3709_v13  ;;  %v3775_v57 = vsub.f32 %v3638_v47, %v3709_v13  ;;  %v3781_v56 = vsub.f32 %v3641_v2, %v3709_v13 }
 0x597   :  { %v1577_v37 = vmul.f32 %v3749_v38, %v3749_v38  ;;  %v1578_v26 = vmul.f32 %v3753_v27, %v3753_v27  ;;  %v1579_v22 = vmul.f32 %v3757_v30, %v3757_v30  ;;  %v1580_v25 = vmul.f32 %v3765_v1, %v3765_v1 }
 0x598   :  { %v1581_v12 = vmul.f32 %v3769_v46, %v3769_v46 }
 0x599   :  { %v1609_v43 = vadd.f32 %v1578_v26, %v1577_v37 }
 0x59b   :  { %v1610_v59 = vadd.f32 %v1609_v43, %v1579_v22 }
 0x59d   :  { %v1611_v36 = vadd.f32 %v1610_v59, %v1580_v25 }
 0x59e   :  { %2368 = shalt.err (!%p2365_p4)
}
 0x59f   :  { %s2369_s11 = scalar_lea.hbm %s4157_s5, 4096 }
 0x5a0   :  { %p2370_p5 = scmp.ne.s32.totalorder %s4157_s5, %s2369_s11  ;;  %p2373_p6 = scmp.lt.u32.totalorder %s2369_s11, %s4157_s5 }
 0x5a2   :  { %p2375_p7 = pnand %p2373_p6, %p2370_p5 }
 0x5a4   :  { %2378 = shalt.err (!%p2375_p7)
}
 0x5a5   :  { %s2407_s16 = smov 128   ;;  %s2408_s17 = smov 8   ;;  %v3802_v47 = vsub.f32 %v3646_v60, %v3709_v13  ;;  %v1582_v2 = vmul.f32 %v3775_v57, %v3775_v57  ;;  %v1612_v42 = vadd.f32 %v1611_v36, %v1581_v12  ;;  %v3808_v33 = vsub.f32 %v3649_v7, %v3709_v13 }
 0x5a6   :  { %1860 = dma.vmem_to_hbm [thread:$0]  %s1855_s7, 4096, %s4157_s5, [#allocation3], %s2407_s16, %s2407_s16, %s2408_s17   ;;  %v1583_v18 = vmul.f32 %v3781_v56, %v3781_v56  ;;  %v3814_v5 = vsub.f32 %v3654_v48, %v3709_v13  ;;  %v3820_v45 = vsub.f32 %v3657_v54, %v3709_v13  ;;  %v3826_v26 = vsub.f32 %v3662_v15, %v3709_v13 }
 0x5a7   :  { %v1613_v4 = vadd.f32 %v1612_v42, %v1582_v2  ;;  %v1584_v60 = vmul.f32 %v3802_v47, %v3802_v47  ;;  %v1585_v7 = vmul.f32 %v3808_v33, %v3808_v33  ;;  %v3832_v43 = vsub.f32 %v3665_v20, %v3709_v13 }
 0x5a8   :  { %v1586_v48 = vmul.f32 %v3814_v5, %v3814_v5  ;;  %v1587_v54 = vmul.f32 %v3820_v45, %v3820_v45  ;;  %v3838_v59 = vsub.f32 %v3670_v61, %v3709_v13  ;;  %v1588_v15 = vmul.f32 %v3826_v26, %v3826_v26 }
 0x5a9   :  { %v1614_v62 = vadd.f32 %v1613_v4, %v1583_v18  ;;  %v3844_v36 = vsub.f32 %v3673_v29, %v3709_v13  ;;  %v1589_v20 = vmul.f32 %v3832_v43, %v3832_v43  ;;  %v3850_v42 = vsub.f32 %v3678_v34, %v3709_v13 }
 0x5aa   :  { %v1590_v61 = vmul.f32 %v3838_v59, %v3838_v59  ;;  %v3856_v4 = vsub.f32 %v3681_v11, %v3709_v13 }
 0x5ab   :  { %v1615_v37 = vadd.f32 %v1614_v62, %v1584_v60  ;;  %v1591_v29 = vmul.f32 %v3844_v36, %v3844_v36  ;;  %v3862_v62 = vsub.f32 %v3686_v28, %v3709_v13  ;;  %v1592_v34 = vmul.f32 %v3850_v42, %v3850_v42 }
 0x5ac   :  { %v1593_v11 = vmul.f32 %v3856_v4, %v3856_v4 }
 0x5ad   :  { %v1616_v22 = vadd.f32 %v1615_v37, %v1585_v7  ;;  %v3868_v37 = vsub.f32 %v3689_v51, %v3709_v13  ;;  %v1594_v28 = vmul.f32 %v3862_v62, %v3862_v62 }
 0x5af   :  { %v1617_v25 = vadd.f32 %v1616_v22, %v1586_v48  ;;  %v3874_v22 = vsub.f32 %v3694_v8, %v3709_v13  ;;  %v1598_v8 = vmul.f32 %v3715_v52, %v3715_v52 }
 0x5b1   :  { %v1618_v12 = vadd.f32 %v1617_v25, %v1587_v54  ;;  %v1595_v25 = vmul.f32 %v3868_v37, %v3868_v37  ;;  %v1596_v51 = vmul.f32 %v3874_v22, %v3874_v22 }
 0x5b3   :  { %v1619_v2 = vadd.f32 %v1618_v12, %v1588_v15 }
 0x5b5   :  { %v1620_v18 = vadd.f32 %v1619_v2, %v1589_v20  ;;  %v1597_v20 = vmul.f32 %v3712_v35, %v3712_v35 }
 0x5b7   :  { %v1621_v60 = vadd.f32 %v1620_v18, %v1590_v61  ;;  %v1599_v61 = vmul.f32 %v3718_v53, %v3718_v53 }
 0x5b9   :  { %v1622_v7 = vadd.f32 %v1621_v60, %v1591_v29  ;;  %v1600_v29 = vmul.f32 %v3721_v50, %v3721_v50 }
 0x5bb   :  { %v1623_v48 = vadd.f32 %v1622_v7, %v1592_v34  ;;  %v1601_v34 = vmul.f32 %v3724_v32, %v3724_v32 }
 0x5bd   :  { %v1624_v54 = vadd.f32 %v1623_v48, %v1593_v11  ;;  %v1602_v11 = vmul.f32 %v3727_v3, %v3727_v3 }
 0x5bf   :  { %v1625_v15 = vadd.f32 %v1624_v54, %v1594_v28  ;;  %v1603_v28 = vmul.f32 %v3730_v39, %v3730_v39 }
 0x5c1   :  { %v1626_v12 = vadd.f32 %v1625_v15, %v1595_v25  ;;  %v1604_v25 = vmul.f32 %v3733_v23, %v3733_v23 }
 0x5c3   :  { %v1627_v2 = vadd.f32 %v1626_v12, %v1596_v51  ;;  %v1605_v51 = vmul.f32 %v3736_v63, %v3736_v63 }
 0x5c5   :  { %v1628_v13 = vadd.f32 %v1627_v2, %v1597_v20  ;;  %v1606_v20 = vmul.f32 %v3739_v31, %v3739_v31 }
 0x5c7   :  { %v1629_v18 = vadd.f32 %v1628_v13, %v1598_v8  ;;  %v1607_v8 = vmul.f32 %v3742_v14, %v3742_v14 }
 0x5c9   :  { %v1630_v60 = vadd.f32 %v1629_v18, %v1599_v61  ;;  %v1608_v61 = vmul.f32 %v3745_v9, %v3745_v9 }
 0x5cb   :  { %v1631_v7 = vadd.f32 %v1630_v60, %v1600_v29 }
 0x5cd   :  { %v1632_v48 = vadd.f32 %v1631_v7, %v1601_v34 }
 0x5cf   :  { %v1633_v54 = vadd.f32 %v1632_v48, %v1602_v11 }
 0x5d1   :  { %v1634_v15 = vadd.f32 %v1633_v54, %v1603_v28 }
 0x5d3   :  { %v1635_v12 = vadd.f32 %v1634_v15, %v1604_v25 }
 0x5d5   :  { %v1636_v2 = vadd.f32 %v1635_v12, %v1605_v51  ;;  %v3909_v51 = vld [vmem:[%s4156_s4 + $0x5] ss:$0 sm:$0xff] }
 0x5d7   :  { %v1637_v13 = vadd.f32 %v1636_v2, %v1606_v20 }
 0x5d9   :  { %v1638_v18 = vadd.f32 %v1637_v13, %v1607_v8  ;;  %v3918_v13 = vld [vmem:[%s4156_s4 + $0x6] ss:$0 sm:$0xff]  ;;  %s2409_s4 = smov [#allocation4]  }
 0x5da   :  { %s1866_s21 = sshll.u32 %s2409_s4, 4  ;;  %s1867_s21 = int_to_ptr.vmem [resolvable:$true] %s1866_s21 }
 0x5db   :  { %v1639_v29 = vadd.f32 %v1638_v18, %v1608_v61  ;;  %s2379_s22 = scalar_lea.vmem %s1867_s21, 4096  ;;  %p2384_p9 = scmp.lt.s32.totalorder %s1867_s21, %s1867_s21 }
 0x5dc   :  { %p2380_p8 = scmp.ne.s32.totalorder %s1867_s21, %s2379_s22  ;;  %p2385_p10 = scmp.lt.s32.totalorder %s2379_s22, %s2379_s22 }
 0x5dd   :  { %v1640_v60 = vrot.slane %v1639_v29, 4 }
 0x5de   :  { %p2386_p11 = por %p2385_p10, %p2384_p9 }
 0x5df   :  { %v1641_v34 = vadd.f32 %v1640_v60, %v1639_v29 }
 0x5e0   :  { %p2387_p12 = pnand %p2386_p11, %p2380_p8 }
 0x5e1   :  { %v1642_v7 = vrot.slane %v1641_v34, 2 }
 0x5e3   :  { %v1643_v11 = vadd.f32 %v1642_v7, %v1641_v34 }
 0x5e5   :  { %v1644_v48 = vrot.slane %v1643_v11, 1 }
 0x5e7   :  { %v1645_v28 = vadd.f32 %v1644_v48, %v1643_v11 }
 0x5e9   :  { %v1646_v54 = vmul.f32 0.00390625, %v1645_v28 }
 0x5eb   :  { %v1647_v25 = vadd.f32 1e-05, %v1646_v54 }
 0x5ed   :  { %2324 = vrsqrt.f32 %v1647_v25 }
 0x5f7   :  { %v2325_v15 = vpop.eup %2324 }
 0x5f8   :  { %v1680_v12 = vmul.f32 %v2325_v15, %v3745_v9  ;;  %v1649_v20 = vmul.f32 %v2325_v15, %v3749_v38  ;;  %v1650_v2 = vmul.f32 %v2325_v15, %v3753_v27  ;;  %v1651_v8 = vmul.f32 %v2325_v15, %v3757_v30 }
 0x5f9   :  { %v1652_v61 = vmul.f32 %v2325_v15, %v3765_v1  ;;  %v1653_v18 = vmul.f32 %v2325_v15, %v3769_v46  ;;  %v1654_v29 = vmul.f32 %v2325_v15, %v3775_v57  ;;  %v1655_v60 = vmul.f32 %v2325_v15, %v3781_v56 }
 0x5fa   :  { %v1716_v9 = vmul.f32 %v3909_v51, %v1680_v12  ;;  %v1656_v38 = vmul.f32 %v2325_v15, %v3802_v47  ;;  %v1657_v27 = vmul.f32 %v2325_v15, %v3808_v33  ;;  %v1658_v30 = vmul.f32 %v2325_v15, %v3814_v5 }
 0x5fb   :  { %v1659_v34 = vmul.f32 %v2325_v15, %v3820_v45  ;;  %v1660_v7 = vmul.f32 %v2325_v15, %v3826_v26  ;;  %v1661_v1 = vmul.f32 %v2325_v15, %v3832_v43  ;;  %v1662_v46 = vmul.f32 %v2325_v15, %v3838_v59 }
 0x5fc   :  { %v1752_v57 = vadd.f32 %v3918_v13, %v1716_v9  ;;  %v1663_v56 = vmul.f32 %v2325_v15, %v3844_v36  ;;  %v1664_v11 = vmul.f32 %v2325_v15, %v3850_v42  ;;  %v1665_v47 = vmul.f32 %v2325_v15, %v3856_v4 }
 0x5fd   :  { %v1666_v33 = vmul.f32 %v2325_v15, %v3862_v62  ;;  %v1667_v5 = vmul.f32 %v2325_v15, %v3868_v37  ;;  %v1668_v45 = vmul.f32 %v2325_v15, %v3874_v22  ;;  %v1669_v26 = vmul.f32 %v2325_v15, %v3712_v35 }
 0x5fe   :  { %v1784_v48 = vmax.f32 %v1752_v57, 0.0  ;;  %v1670_v43 = vmul.f32 %v2325_v15, %v3715_v52  ;;  %v1671_v59 = vmul.f32 %v2325_v15, %v3718_v53  ;;  %v1672_v28 = vmul.f32 %v2325_v15, %v3721_v50 }
 0x5ff   :  { %v1673_v36 = vmul.f32 %v2325_v15, %v3724_v32  ;;  %v1674_v42 = vmul.f32 %v2325_v15, %v3727_v3  ;;  %v1675_v4 = vmul.f32 %v2325_v15, %v3730_v39  ;;  %v1676_v62 = vmul.f32 %v2325_v15, %v3733_v23 }
 0x600   :  { %v1816_v37 = vadd.f32 %v1784_v48, %v3491_v10  ;;  %v1677_v22 = vmul.f32 %v2325_v15, %v3736_v63  ;;  %v1678_v35 = vmul.f32 %v2325_v15, %v3739_v31  ;;  %v1679_v52 = vmul.f32 %v2325_v15, %v3742_v14 }
 0x601   :  { %v1685_v53 = vmul.f32 %v3909_v51, %v1649_v20  ;;  %v1686_v50 = vmul.f32 %v3909_v51, %v1650_v2  ;;  %v1687_v32 = vmul.f32 %v3909_v51, %v1651_v8  ;;  %v1688_v3 = vmul.f32 %v3909_v51, %v1652_v61 }
 0x602   :  { %1848 = vst [vmem:[#allocation4 + $0xf8] sm:$0xff] %v1816_v37  ;;  %v1689_v39 = vmul.f32 %v3909_v51, %v1653_v18  ;;  %v1690_v23 = vmul.f32 %v3909_v51, %v1654_v29  ;;  %v1691_v10 = vmul.f32 %v3909_v51, %v1655_v60  ;;  %v1692_v63 = vmul.f32 %v3909_v51, %v1656_v38 }
 0x603   :  { %v1693_v31 = vmul.f32 %v3909_v51, %v1657_v27  ;;  %v1694_v14 = vmul.f32 %v3909_v51, %v1658_v30  ;;  %v1695_v54 = vmul.f32 %v3909_v51, %v1659_v34  ;;  %v1696_v25 = vmul.f32 %v3909_v51, %v1660_v7 }
 0x604   :  { %v1697_v15 = vmul.f32 %v3909_v51, %v1661_v1  ;;  %v1698_v12 = vmul.f32 %v3909_v51, %v1662_v46  ;;  %v1699_v20 = vmul.f32 %v3909_v51, %v1663_v56  ;;  %v1700_v2 = vmul.f32 %v3909_v51, %v1664_v11 }
 0x605   :  { %v1701_v8 = vmul.f32 %v3909_v51, %v1665_v47  ;;  %v1702_v61 = vmul.f32 %v3909_v51, %v1666_v33  ;;  %v1703_v18 = vmul.f32 %v3909_v51, %v1667_v5  ;;  %v1704_v29 = vmul.f32 %v3909_v51, %v1668_v45 }
 0x606   :  { %v1705_v60 = vmul.f32 %v3909_v51, %v1669_v26  ;;  %v1706_v9 = vmul.f32 %v3909_v51, %v1670_v43  ;;  %v1707_v38 = vmul.f32 %v3909_v51, %v1671_v59  ;;  %v1708_v27 = vmul.f32 %v3909_v51, %v1672_v28 }
 0x607   :  { %v1709_v30 = vmul.f32 %v3909_v51, %v1673_v36  ;;  %v1710_v34 = vmul.f32 %v3909_v51, %v1674_v42  ;;  %v1711_v7 = vmul.f32 %v3909_v51, %v1675_v4  ;;  %v1712_v1 = vmul.f32 %v3909_v51, %v1676_v62 }
 0x608   :  { %v1713_v46 = vmul.f32 %v3909_v51, %v1677_v22  ;;  %v1714_v57 = vmul.f32 %v3909_v51, %v1678_v35  ;;  %v1715_v56 = vmul.f32 %v3909_v51, %v1679_v52  ;;  %v3983_v11 = vadd.f32 %v3918_v13, %v1685_v53 }
 0x609   :  { %v3986_v47 = vadd.f32 %v3918_v13, %v1686_v50  ;;  %v3989_v33 = vadd.f32 %v3918_v13, %v1687_v32  ;;  %v3992_v5 = vadd.f32 %v3918_v13, %v1688_v3  ;;  %v3995_v45 = vadd.f32 %v3918_v13, %v1689_v39 }
 0x60a   :  { %v3998_v26 = vadd.f32 %v3918_v13, %v1690_v23  ;;  %v4001_v51 = vadd.f32 %v3918_v13, %v1691_v10  ;;  %v4004_v48 = vadd.f32 %v3918_v13, %v1692_v63  ;;  %v4007_v43 = vadd.f32 %v3918_v13, %v1693_v31 }
 0x60b   :  { %v4010_v59 = vadd.f32 %v3918_v13, %v1694_v14  ;;  %v4013_v28 = vadd.f32 %v3918_v13, %v1695_v54  ;;  %v4016_v36 = vadd.f32 %v3918_v13, %v1696_v25  ;;  %v4019_v42 = vadd.f32 %v3918_v13, %v1697_v15 }
 0x60c   :  { %v4022_v4 = vadd.f32 %v3918_v13, %v1698_v12  ;;  %v4025_v62 = vadd.f32 %v3918_v13, %v1699_v20  ;;  %v4028_v37 = vadd.f32 %v3918_v13, %v1700_v2  ;;  %v4031_v22 = vadd.f32 %v3918_v13, %v1701_v8 }
 0x60d   :  { %v4034_v35 = vadd.f32 %v3918_v13, %v1702_v61  ;;  %v4037_v52 = vadd.f32 %v3918_v13, %v1703_v18  ;;  %v4040_v53 = vadd.f32 %v3918_v13, %v1704_v29  ;;  %v4043_v50 = vadd.f32 %v3918_v13, %v1705_v60 }
 0x60e   :  { %v4046_v32 = vadd.f32 %v3918_v13, %v1706_v9  ;;  %v4049_v3 = vadd.f32 %v3918_v13, %v1707_v38  ;;  %v4052_v39 = vadd.f32 %v3918_v13, %v1708_v27  ;;  %v4055_v23 = vadd.f32 %v3918_v13, %v1709_v30 }
 0x60f   :  { %v4058_v10 = vadd.f32 %v3918_v13, %v1710_v34  ;;  %v4061_v63 = vadd.f32 %v3918_v13, %v1711_v7  ;;  %v4064_v31 = vadd.f32 %v3918_v13, %v1712_v1  ;;  %v4067_v14 = vadd.f32 %v3918_v13, %v1713_v46 }
 0x610   :  { %v4070_v54 = vadd.f32 %v3918_v13, %v1714_v57  ;;  %v4073_v25 = vadd.f32 %v3918_v13, %v1715_v56  ;;  %v1753_v15 = vmax.f32 %v3983_v11, 0.0  ;;  %v1754_v12 = vmax.f32 %v3986_v47, 0.0 }
 0x611   :  { %v1755_v20 = vmax.f32 %v3989_v33, 0.0  ;;  %v1756_v2 = vmax.f32 %v3992_v5, 0.0  ;;  %v1757_v8 = vmax.f32 %v3995_v45, 0.0  ;;  %v1758_v61 = vmax.f32 %v3998_v26, 0.0 }
 0x612   :  { %v1759_v18 = vmax.f32 %v4001_v51, 0.0  ;;  %v1760_v29 = vmax.f32 %v4004_v48, 0.0  ;;  %v1761_v60 = vmax.f32 %v4007_v43, 0.0  ;;  %v1762_v13 = vmax.f32 %v4010_v59, 0.0 }
 0x613   :  { %v1763_v9 = vmax.f32 %v4013_v28, 0.0  ;;  %v1764_v38 = vmax.f32 %v4016_v36, 0.0  ;;  %v1765_v27 = vmax.f32 %v4019_v42, 0.0  ;;  %v1766_v30 = vmax.f32 %v4022_v4, 0.0 }
 0x614   :  { %v1767_v34 = vmax.f32 %v4025_v62, 0.0  ;;  %v1768_v7 = vmax.f32 %v4028_v37, 0.0  ;;  %v1769_v1 = vmax.f32 %v4031_v22, 0.0  ;;  %v1770_v46 = vmax.f32 %v4034_v35, 0.0 }
 0x615   :  { %v1771_v57 = vmax.f32 %v4037_v52, 0.0  ;;  %v1772_v56 = vmax.f32 %v4040_v53, 0.0  ;;  %v1773_v11 = vmax.f32 %v4043_v50, 0.0  ;;  %v1774_v47 = vmax.f32 %v4046_v32, 0.0 }
 0x616   :  { %v1775_v33 = vmax.f32 %v4049_v3, 0.0  ;;  %v1776_v5 = vmax.f32 %v4052_v39, 0.0  ;;  %v1777_v45 = vmax.f32 %v4055_v23, 0.0  ;;  %v1778_v26 = vmax.f32 %v4058_v10, 0.0  ;;  %v4264_v39 = vld [vmem:[#allocation27_spill] sm:$0xff]  ;;  %v4266_v10 = vld [vmem:[#allocation8_spill] sm:$0xff] }
 0x617   :  { %v1779_v51 = vmax.f32 %v4061_v63, 0.0  ;;  %v1780_v48 = vmax.f32 %v4064_v31, 0.0  ;;  %v1781_v43 = vmax.f32 %v4067_v14, 0.0  ;;  %v1782_v59 = vmax.f32 %v4070_v54, 0.0  ;;  %v4267_v31 = vld [vmem:[#allocation9_spill] sm:$0xff]  ;;  %v4268_v54 = vld [vmem:[#allocation10_spill] sm:$0xff] }
 0x618   :  { %v1783_v28 = vmax.f32 %v4073_v25, 0.0  ;;  %v1785_v36 = vadd.f32 %v1753_v15, %v3339_v58  ;;  %v1786_v42 = vadd.f32 %v1754_v12, %v3342_v44  ;;  %v1787_v4 = vadd.f32 %v1755_v20, %v3333_v19  ;;  %v4259_v44 = vld [vmem:[#allocation24_spill] sm:$0xff]  ;;  %v4269_v15 = vld [vmem:[#allocation11_spill] sm:$0xff] }
 0x619   :  { %v1788_v62 = vadd.f32 %v1756_v2, %v3336_v55  ;;  %v1789_v37 = vadd.f32 %v1757_v8, %v3345_v16  ;;  %v1790_v22 = vadd.f32 %v1758_v61, %v3348_v49  ;;  %v1791_v35 = vadd.f32 %v1759_v18, %v3351_v17  ;;  %v4260_v49 = vld [vmem:[#allocation21_spill] sm:$0xff]  ;;  %v4261_v17 = vld [vmem:[#allocation22_spill] sm:$0xff]  ;;  %v4270_v20 = vld [vmem:[#allocation19_spill] sm:$0xff] }
 0x61a   :  { %v1792_v52 = vadd.f32 %v1760_v29, %v3354_v6  ;;  %v1793_v53 = vadd.f32 %v1761_v60, %v3374_v40  ;;  %v1794_v50 = vadd.f32 %v1762_v13, %v3377_v24  ;;  %v1795_v58 = vadd.f32 %v1763_v9, %v3380_v41  ;;  %1817 = vst [vmem:[#allocation4] sm:$0xff] %v1785_v36  ;;  %v4262_v40 = vld [vmem:[#allocation23_spill] sm:$0xff]  ;;  %v4263_v41 = vld [vmem:[#allocation26_spill] sm:$0xff]  ;;  %v4271_v8 = vld [vmem:[#allocation25_spill] sm:$0xff] }
 0x61b   :  { %1818 = vst [vmem:[#allocation4 + $0x8] sm:$0xff] %v1786_v42  ;;  %1819 = vst [vmem:[#allocation4 + $0x10] sm:$0xff] %v1787_v4  ;;  %v1796_v19 = vadd.f32 %v1764_v38, %v3383_v21  ;;  %v1797_v55 = vadd.f32 %v1765_v27, %v3392_v0  ;;  %v1798_v16 = vadd.f32 %v1766_v30, %v4259_v44  ;;  %v4265_v21 = vld [vmem:[#allocation28_spill] sm:$0xff]  ;;  %v4274_v9 = vld [vmem:[#allocation13_spill] sm:$0xff] }
 0x61c   :  { %v1799_v32 = vadd.f32 %v1767_v34, %v4260_v49  ;;  %1820 = vst [vmem:[#allocation4 + $0x18] sm:$0xff] %v1788_v62  ;;  %1821 = vst [vmem:[#allocation4 + $0x20] sm:$0xff] %v1789_v37  ;;  %v1800_v6 = vadd.f32 %v1768_v7, %v4261_v17  ;;  %v1801_v24 = vadd.f32 %v1769_v1, %v4262_v40  ;;  %v4272_v18 = vld [vmem:[#allocation12_spill] sm:$0xff]  ;;  %v4275_v27 = vld [vmem:[#allocation14_spill] sm:$0xff] }
 0x61d   :  { %1822 = vst [vmem:[#allocation4 + $0x28] sm:$0xff] %v1790_v22  ;;  %1823 = vst [vmem:[#allocation4 + $0x30] sm:$0xff] %v1791_v35  ;;  %v1802_v3 = vadd.f32 %v1770_v46, %v4263_v41  ;;  %v1803_v23 = vadd.f32 %v1771_v57, %v4264_v39  ;;  %v1804_v0 = vadd.f32 %v1772_v56, %v4265_v21  ;;  %v4273_v60 = vld [vmem:[#allocation20_spill] sm:$0xff]  ;;  %v4276_v34 = vld [vmem:[#allocation15_spill] sm:$0xff] }
 0x61e   :  { %1824 = vst [vmem:[#allocation4 + $0x38] sm:$0xff] %v1792_v52  ;;  %1825 = vst [vmem:[#allocation4 + $0x40] sm:$0xff] %v1793_v53  ;;  %v1805_v63 = vadd.f32 %v1773_v11, %v4266_v10  ;;  %v1806_v14 = vadd.f32 %v1774_v47, %v4267_v31  ;;  %v1807_v25 = vadd.f32 %v1775_v33, %v4268_v54 }
 0x61f   :  { %1826 = vst [vmem:[#allocation4 + $0x48] sm:$0xff] %v1794_v50  ;;  %1827 = vst [vmem:[#allocation4 + $0x50] sm:$0xff] %v1795_v58  ;;  %v1808_v12 = vadd.f32 %v1776_v5, %v4269_v15  ;;  %v1809_v2 = vadd.f32 %v1777_v45, %v4270_v20  ;;  %v1810_v61 = vadd.f32 %v1778_v26, %v4271_v8 }
 0x620   :  { %1828 = vst [vmem:[#allocation4 + $0x58] sm:$0xff] %v1796_v19  ;;  %1829 = vst [vmem:[#allocation4 + $0x60] sm:$0xff] %v1797_v55  ;;  %v1811_v29 = vadd.f32 %v1779_v51, %v4272_v18  ;;  %v1812_v13 = vadd.f32 %v1780_v48, %v4273_v60  ;;  %v1813_v38 = vadd.f32 %v1781_v43, %v4274_v9 }
 0x621   :  { %1830 = vst [vmem:[#allocation4 + $0x68] sm:$0xff] %v1798_v16  ;;  %1831 = vst [vmem:[#allocation4 + $0x70] sm:$0xff] %v1799_v32  ;;  %v1814_v30 = vadd.f32 %v1782_v59, %v4275_v27  ;;  %v1815_v7 = vadd.f32 %v1783_v28, %v4276_v34 }
 0x622   :  { %1832 = vst [vmem:[#allocation4 + $0x78] sm:$0xff] %v1800_v6  ;;  %1833 = vst [vmem:[#allocation4 + $0x80] sm:$0xff] %v1801_v24 }
 0x623   :  { %1834 = vst [vmem:[#allocation4 + $0x88] sm:$0xff] %v1802_v3  ;;  %1835 = vst [vmem:[#allocation4 + $0x90] sm:$0xff] %v1803_v23 }
 0x624   :  { %1836 = vst [vmem:[#allocation4 + $0x98] sm:$0xff] %v1804_v0  ;;  %1837 = vst [vmem:[#allocation4 + $0xa0] sm:$0xff] %v1805_v63 }
 0x625   :  { %1838 = vst [vmem:[#allocation4 + $0xa8] sm:$0xff] %v1806_v14  ;;  %1839 = vst [vmem:[#allocation4 + $0xb0] sm:$0xff] %v1807_v25 }
 0x626   :  { %1840 = vst [vmem:[#allocation4 + $0xb8] sm:$0xff] %v1808_v12  ;;  %1841 = vst [vmem:[#allocation4 + $0xc0] sm:$0xff] %v1809_v2 }
 0x627   :  { %1842 = vst [vmem:[#allocation4 + $0xc8] sm:$0xff] %v1810_v61  ;;  %1843 = vst [vmem:[#allocation4 + $0xd0] sm:$0xff] %v1811_v29 }
 0x628   :  { %1844 = vst [vmem:[#allocation4 + $0xd8] sm:$0xff] %v1812_v13  ;;  %1845 = vst [vmem:[#allocation4 + $0xe0] sm:$0xff] %v1813_v38 }
 0x629   :  { %1846 = vst [vmem:[#allocation4 + $0xe8] sm:$0xff] %v1814_v30  ;;  %1847 = vst [vmem:[#allocation4 + $0xf0] sm:$0xff] %v1815_v7 }
 0x62a   :  { %2390 = shalt.err (!%p2387_p12)
}
 0x62b   :  { %s2391_s25 = scalar_lea.hbm %s4158_s6, 4096 }
 0x62c   :  { %p2392_p13 = scmp.ne.s32.totalorder %s4158_s6, %s2391_s25  ;;  %p2395_p0 = scmp.lt.u32.totalorder %s2391_s25, %s4158_s6 }
 0x62e   :  { %p2397_p1 = pnand %p2395_p0, %p2392_p13 }
 0x630   :  { %2400 = shalt.err (!%p2397_p1)
}
 0x631   :  { %1872 = dma.vmem_to_hbm [thread:$0]  %s1867_s21, 4096, %s4158_s6, [#allocation5], %s2407_s16, %s2407_s16, %s2408_s17  }
 0x632   :  { %2401 = dma.done.wait [#allocation3], 4096  }
 0x633   :  { %2402 = vsyncadd [#allocation3], 4294963200 }
 0x634   :  { %2403 = dma.done.wait [#allocation5], 4096  }
 0x635   :  { %2404 = vsyncadd [#allocation5], 4294963200 }
 0x636   :  { %1879 = vsyncpa [#allocation3], 1 }
 0x637   :  { %1880 = vsyncpa [#allocation5], 1 }

</bundles_post_ra>
